<compile_context>
chip_gen: v7x
topology: tpu7x:2x2x1
jax: 0.10.0
libtpu: 0.0.40
codegen_flags: <defaults>
</compile_context>

<pallas_src>
import functools

import numpy as np
import jax
import jax.numpy as jnp
from jax.experimental import pallas as pl
from jax.experimental.pallas import tpu as pltpu

FILT_LEN = 8  # db4 -> 8 taps
_VMEM_LIMIT_BYTES = 32 * 1024 * 1024   # safe scoped-VMEM limit on v5e/v6e/v7x
_BLOCK_BUDGET_BYTES = 16 * 1024 * 1024  # per-step VMEM window target

# pywt.Wavelet('db4').rec_lo  (deterministic parameter init, as in __init__)
_DB4_REC_LO = [
    0.23037781330885523, 0.7148465705525415, 0.6308807679295904,
    -0.02798376941698385, -0.18703481171888114, 0.030841381835986965,
    0.032883011666982945, -0.010597401784997278,
]

_SMEM_SPEC = pl.BlockSpec(memory_space=pltpu.MemorySpace.SMEM)


# ---------------------------------------------------------------------------
# Filter bank — mirrors torch_orthogonal_filter_bank / torch_qmf (traceable)
# ---------------------------------------------------------------------------
def orthogonal_filter_bank(weights):
    w = jnp.asarray(weights, jnp.float32)
    if w.ndim != 1:
        raise ValueError("`scaling_filter` must be a 1-D tensor.")
    if w.shape[0] % 2 != 0:
        raise ValueError("`scaling_filter` length has to be even.")
    rec_lo = jnp.sqrt(jnp.float32(2.0)) * w / jnp.sum(w)
    dec_lo = rec_lo[::-1]
    qm = rec_lo[::-1]                       # torch_qmf: flip, negate odd idx
    rec_hi = qm.at[1::2].set(-qm[1::2])
    dec_hi = rec_hi[::-1]
    return dec_lo, dec_hi, rec_lo, rec_hi


def _row_tile(n_rows, per_row_bytes, budget_bytes=_BLOCK_BUDGET_BYTES):
    """Largest multiple-of-8 row tile whose VMEM window fits the budget."""
    t = (budget_bytes // max(per_row_bytes, 1)) // 8 * 8
    t = max(t, 8)
    return n_rows if t >= n_rows else t


def _compiler_params():
    return pltpu.CompilerParams(
        dimension_semantics=("parallel",),
        vmem_limit_bytes=_VMEM_LIMIT_BYTES)


# ---------------------------------------------------------------------------
# Pallas kernels
# ---------------------------------------------------------------------------
def _dwt_kernel(xe_ref, xo_ref, flo_ref, fhi_ref, ca_ref, cd_ref,
                e_scr, o_scr):
    """Analysis filter bank (one level), padding fused in-kernel.

    xe/xo: even/odd phases of the *unpadded* signal, shapes (R, Le)/(R, Lo).
    flo/fhi: reversed dec_lo / dec_hi (correlation filters), SMEM (8,).
    ca/cd: (R, A);  cA[n] = sum_k xpad[2n+k]*flo[k]  (stride-2 correlation),
    where xpad is the half-sample symmetric extension, built here in VMEM
    scratch (e_scr/o_scr hold its even/odd phases, length A+3 each).
    """
    A = ca_ref.shape[1]
    Le = xe_ref.shape[1]
    Lo = xo_ref.shape[1]
    L = Le + Lo

    xe = xe_ref[...]
    xo = xo_ref[...]

    # interior of the padded phases
    e_scr[:, 3:3 + Le] = xe
    o_scr[:, 3:3 + Lo] = xo
    # left half-sample symmetric edge: 3 reversed samples from the other phase
    for k in range(3):
        e_scr[:, k:k + 1] = xo[:, 2 - k:3 - k]
        o_scr[:, k:k + 1] = xe[:, 2 - k:3 - k]
    # right edge (3 samples for E; 3 or 4 for O depending on L parity)
    for k in range(3):
        e_scr[:, 3 + Le + k:4 + Le + k] = xo[:, Lo - 1 - k:Lo - k]
    ro = 3 if L % 2 == 0 else 4
    for k in range(ro):
        o_scr[:, 3 + Lo + k:4 + Lo + k] = xe[:, Le - 1 - k:Le - k]

    e_pad = e_scr[...]          # (R, A+3) == even phase of padded signal
    o_pad = o_scr[...]          # (R, A+3) == odd  phase of padded signal

    # hoist SMEM tap reads into locals (each used once below)
    f_lo = [flo_ref[k] for k in range(FILT_LEN)]
    f_hi = [fhi_ref[k] for k in range(FILT_LEN)]

    acc_lo = jnp.zeros(ca_ref.shape, jnp.float32)
    acc_hi = jnp.zeros(cd_ref.shape, jnp.float32)
    for j in range(FILT_LEN // 2):          # static unrolled shift-and-scale
        e = e_pad[:, j:j + A]
        o = o_pad[:, j:j + A]
        acc_lo = acc_lo + e * f_lo[2 * j] + o * f_lo[2 * j + 1]
        acc_hi = acc_hi + e * f_hi[2 * j] + o * f_hi[2 * j + 1]
    ca_ref[...] = acc_lo
    cd_ref[...] = acc_hi


def _sfb_kernel(lo_ref, hi_ref, g0_ref, g1_ref, ev_ref, od_ref):
    """Synthesis filter bank (one level) == conv_transpose1d(stride=2, pad=6).

    rec[2t]   = sum_j lo[t+3-j]*g0[2j]   + hi[t+3-j]*g1[2j]
    rec[2t+1] = sum_j lo[t+3-j]*g0[2j+1] + hi[t+3-j]*g1[2j+1]
    ev/od: (R, N-3); the wrapper interleaves them (one fused XLA pass).
    """
    T = ev_ref.shape[1]
    lo = lo_ref[...]
    hi = hi_ref[...]
    g0 = [g0_ref[k] for k in range(FILT_LEN)]
    g1 = [g1_ref[k] for k in range(FILT_LEN)]
    acc_e = jnp.zeros(ev_ref.shape, jnp.float32)
    acc_o = jnp.zeros(od_ref.shape, jnp.float32)
    for j in range(FILT_LEN // 2):
        sl = lo[:, 3 - j:3 - j + T]
        sh = hi[:, 3 - j:3 - j + T]
        acc_e = acc_e + sl * g0[2 * j] + sh * g1[2 * j]
        acc_o = acc_o + sl * g0[2 * j + 1] + sh * g1[2 * j + 1]
    ev_ref[...] = acc_e
    od_ref[...] = acc_o


# ---------------------------------------------------------------------------
# Kernel wrappers
# ---------------------------------------------------------------------------
def dwt_pallas(x, dec_lo, dec_hi, row_tile=None):
    """pytorch_wavelets DWT1D(mode='symmetric'), one level. x: (B, C, L)."""
    B, C, L = x.shape
    if L < FILT_LEN - 1:
        # TODO(synk): very short signals need multi-reflection symmetric
        # extension, not implemented by the fused in-kernel padding.
        raise ValueError(f"dwt_pallas requires L >= {FILT_LEN - 1}, got {L}")
    A = (L + FILT_LEN - 1) // 2                       # pywt.dwt_coeff_len
    BC = B * C

    xf = x.reshape(BC, L).astype(jnp.float32)
    xe = xf[:, 0::2]                                  # (BC, ceil(L/2))
    xo = xf[:, 1::2]                                  # (BC, floor(L/2))
    Le, Lo = xe.shape[1], xo.shape[1]

    flo = jnp.asarray(dec_lo, jnp.float32)[::-1]      # correlation filters
    fhi = jnp.asarray(dec_hi, jnp.float32)[::-1]

    # per-row bytes: double-buffered in/out blocks + single-buffered scratch
    per_row_bytes = 4 * (2 * (Le + Lo + 2 * A) + 2 * (A + 3))
    tile_r = min(row_tile, BC) if row_tile is not None else \
        _row_tile(BC, per_row_bytes)
    grid = (pl.cdiv(BC, tile_r),)

    ca, cd = pl.pallas_call(
        _dwt_kernel,
        out_shape=(jax.ShapeDtypeStruct((BC, A), jnp.float32),
                   jax.ShapeDtypeStruct((BC, A), jnp.float32)),
        grid=grid,
        in_specs=[
            pl.BlockSpec((tile_r, Le), lambda i: (i, 0)),
            pl.BlockSpec((tile_r, Lo), lambda i: (i, 0)),
            _SMEM_SPEC,
            _SMEM_SPEC,
        ],
        out_specs=(pl.BlockSpec((tile_r, A), lambda i: (i, 0)),
                   pl.BlockSpec((tile_r, A), lambda i: (i, 0))),
        scratch_shapes=[pltpu.VMEM((tile_r, A + 3), jnp.float32),
                        pltpu.VMEM((tile_r, A + 3), jnp.float32)],
        compiler_params=_compiler_params(),
    )(xe, xo, flo, fhi)
    return ca.reshape(B, C, A), cd.reshape(B, C, A)


def sfb_pallas(lo, hi, rec_lo, rec_hi, row_tile=None):
    """pytorch_wavelets SFB1D(mode='symmetric'): (B,C,N)x2 -> (B,C,2N-6)."""
    B, C, N = lo.shape
    if N < 4:
        raise ValueError(f"sfb_pallas requires N >= 4, got {N}")
    T = N - 3
    BC = B * C

    g0 = jnp.asarray(rec_lo, jnp.float32)
    g1 = jnp.asarray(rec_hi, jnp.float32)

    per_row_bytes = 4 * 2 * (2 * N + 2 * T)
    tile_r = min(row_tile, BC) if row_tile is not None else \
        _row_tile(BC, per_row_bytes)
    grid = (pl.cdiv(BC, tile_r),)

    ev, od = pl.pallas_call(
        _sfb_kernel,
        out_shape=(jax.ShapeDtypeStruct((BC, T), jnp.float32),
                   jax.ShapeDtypeStruct((BC, T), jnp.float32)),
        grid=grid,
        in_specs=[
            pl.BlockSpec((tile_r, N), lambda i: (i, 0)),
            pl.BlockSpec((tile_r, N), lambda i: (i, 0)),
            _SMEM_SPEC,
            _SMEM_SPEC,
        ],
        out_specs=(pl.BlockSpec((tile_r, T), lambda i: (i, 0)),
                   pl.BlockSpec((tile_r, T), lambda i: (i, 0))),
        compiler_params=_compiler_params(),
    )(lo.reshape(BC, N).astype(jnp.float32),
      hi.reshape(BC, N).astype(jnp.float32), g0, g1)

    # TODO(synk): lane-stride-2 interleave inside the kernel is not reliably
    # lowerable in Mosaic; the even/odd interleave stays as one fused XLA pass.
    rec = jnp.stack([ev, od], axis=-1).reshape(BC, 2 * T)
    return rec.reshape(B, C, 2 * T)


# ---------------------------------------------------------------------------
# WaveletDWTLayer.forward (glue around the kernels)
# ---------------------------------------------------------------------------
def run_idwt(cA, cDs, rec_lo, rec_hi, number_coeffs_for_rec, filler_value,
             real_lens=None):
    """IDWT1D chain.  `real_lens[c]` = real (non-filler) length of channel c.

    If real_lens is None, falls back to the torch-faithful data-dependent
    sentinel count (forces a host sync; not usable under jax.jit)."""
    cA_t = jnp.zeros_like(cA)
    n_ch = cDs.shape[1]
    if real_lens is None:
        cDs_host = np.asarray(cDs[0])
        real_lens = tuple(int(np.sum(cDs_host[c] != filler_value))
                          for c in range(n_ch))
    if len(real_lens) != n_ch:
        raise ValueError("real_lens must have one entry per cDs channel")

    cDs_t = []
    for cD_number in reversed(range(n_ch)):
        cD_with_pad = cDs[:, cD_number:cD_number + 1, :]
        real_len = int(real_lens[cD_number])
        cD_real = cD_with_pad[:, :, :real_len]
        if cD_number in range(number_coeffs_for_rec):
            cDs_t.append(cD_real)
        else:
            cDs_t.append(jnp.zeros_like(cD_real))

    # DWT1DInverse.forward (mode='symmetric'): coarsest level first
    x0 = cA_t
    for x1 in cDs_t[::-1]:
        if x0.shape[-1] > x1.shape[-1]:
            x0 = x0[..., :-1]
        if x0.shape[-1] != x1.shape[-1]:
            raise ValueError("incompatible coefficient lengths in IDWT")
        x0 = sfb_pallas(x0, x1, rec_lo, rec_hi)
    return x0


def wavelet_dwt_layer_forward(x1, x2, x3, weights, layer_number=0,
                              number_coeffs_for_rec=2, filler_value=10.1,
                              real_lens=None):
    """WaveletDWTLayer.forward.  `real_lens` = static real lengths of x2's
    channels; pass them to avoid the host sync and enable jax.jit."""
    # update_wavelet() only rebuilds pywt.Wavelet metadata -> no-op here.
    dec_lo, dec_hi, rec_lo, rec_hi = orthogonal_filter_bank(weights)

    # run_dwt
    if x1.ndim == 2:
        sig = x1[:, None, :]
    elif x1.ndim == 3:
        sig = x1
    else:
        raise ValueError(f"Expected 2D or 3D tensor, got {x1.ndim}D")
    cA, cD = dwt_pallas(sig, dec_lo, dec_hi)

    if layer_number == 1:
        return cA, cD, x3

    pad_len = x2.shape[-1] - cD.shape[-1]
    pad = jnp.full((cD.shape[0], 1, pad_len), filler_value, dtype=cD.dtype)
    cD_padded = jnp.concatenate([cD, pad], axis=-1)
    cDs = jnp.concatenate([x2, cD_padded], axis=1)

    if real_lens is not None:
        full_real_lens = tuple(int(r) for r in real_lens) + (cD.shape[-1],)
    else:
        full_real_lens = None

    R = run_idwt(cA, cDs, rec_lo, rec_hi, number_coeffs_for_rec, filler_value,
                 real_lens=full_real_lens)
    if layer_number == 2:
        reconstructions = R
    else:
        reconstructions = jnp.concatenate([x3, R], axis=1)
    return cA, cDs, reconstructions


# ---------------------------------------------------------------------------
# Pure-numpy references for the two kernels (sanity checks only)
# ---------------------------------------------------------------------------
def _dwt_ref(x, dec_lo, dec_hi):
    x = np.asarray(x, np.float32)
    B, C, L = x.shape
    A = (L + FILT_LEN - 1) // 2
    p = 2 * (A - 1) - L + FILT_LEN
    pl_, pr = p // 2, (p + 1) // 2
    idx = np.arange(-pl_, L + pr)
    idx = np.where(idx < 0, -1 - idx, idx)
    idx = np.where(idx >= L, 2 * L - 1 - idx, idx)
    xp = x.reshape(B * C, L)[:, idx]
    flo = np.asarray(dec_lo, np.float32)[::-1]
    fhi = np.asarray(dec_hi, np.float32)[::-1]
    ca = np.zeros((B * C, A), np.float32)
    cd = np.zeros((B * C, A), np.float32)
    for n in range(A):
        seg = xp[:, 2 * n: 2 * n + FILT_LEN]
        ca[:, n] = seg @ flo
        cd[:, n] = seg @ fhi
    return ca.reshape(B, C, A), cd.reshape(B, C, A)


def _sfb_ref(lo, hi, g0, g1):
    lo = np.asarray(lo, np.float32)
    hi = np.asarray(hi, np.float32)
    B, C, N = lo.shape
    lo2 = lo.reshape(B * C, N)
    hi2 = hi.reshape(B * C, N)
    g0 = np.asarray(g0, np.float32)
    g1 = np.asarray(g1, np.float32)
    out = np.zeros((B * C, 2 * N - 6), np.float32)
    for i in range(2 * N - 6):
        for m in range(N):
            k = i + FILT_LEN - 2 - 2 * m
            if 0 <= k < FILT_LEN:
                out[:, i] += lo2[:, m] * g0[k] + hi2[:, m] * g1[k]
    return out.reshape(B, C, 2 * N - 6)


# ---------------------------------------------------------------------------
if __name__ == "__main__":
    key = jax.random.PRNGKey(0)
    k1, k2, k3, k4, k5, k6 = jax.random.split(key, 6)

    B = 2
    L = 12                  # -> cA/cD length A = 9
    filler = 10.1
    weights = jnp.asarray(_DB4_REC_LO, dtype=jnp.float32)   # nn.Parameter init

    x1 = jax.random.normal(k1, (B, 1, L), dtype=jnp.float32)
    # x2 = accumulated cDs from a previous layer: 8 real values then filler.
    x2_real = jax.random.normal(k2, (B, 1, 8), dtype=jnp.float32)
    x2 = jnp.concatenate(
        [x2_real, jnp.full((B, 1, L - 8), filler, dtype=jnp.float32)], axis=-1)
    x3 = jax.random.normal(k3, (B, 2, L), dtype=jnp.float32)

    # Jitted forward (static real_lens -> no host sync inside the trace).
    fwd = jax.jit(functools.partial(
        wavelet_dwt_layer_forward, layer_number=3, number_coeffs_for_rec=2,
        filler_value=filler, real_lens=(8,)))
    cA, cDs, rec = fwd(x1, x2, x3, weights)
    jax.block_until_ready((cA, cDs, rec))

    assert cA.shape == (B, 1, 9)
    assert cDs.shape == (B, 2, L)
    assert rec.shape == (B, 3, L)

    # Torch-faithful sentinel path (host sync) must agree with the jitted path.
    cA_f, cDs_f, rec_f = wavelet_dwt_layer_forward(
        x1, x2, x3, weights, layer_number=3, number_coeffs_for_rec=2,
        filler_value=filler)
    assert np.allclose(np.asarray(cA), np.asarray(cA_f), rtol=1e-5, atol=1e-6)
    assert np.allclose(np.asarray(cDs), np.asarray(cDs_f), rtol=1e-5, atol=1e-6)
    assert np.allclose(np.asarray(rec), np.asarray(rec_f), rtol=1e-5, atol=1e-6)

    # Kernel-level sanity checks against independent numpy references.
    dec_lo, dec_hi, rec_lo, rec_hi = orthogonal_filter_bank(weights)

    # (a) small single-block DWT, even L
    ca_k, cd_k = dwt_pallas(x1, dec_lo, dec_hi)
    ca_r, cd_r = _dwt_ref(x1, dec_lo, dec_hi)
    assert np.allclose(np.asarray(ca_k), ca_r, rtol=1e-4, atol=1e-5)
    assert np.allclose(np.asarray(cd_k), cd_r, rtol=1e-4, atol=1e-5)

    # (b) gridded DWT (3 row blocks of 8), odd L
    xb = jax.random.normal(k4, (3, 8, 129), dtype=jnp.float32)
    ca_k, cd_k = dwt_pallas(xb, dec_lo, dec_hi, row_tile=8)
    ca_r, cd_r = _dwt_ref(xb, dec_lo, dec_hi)
    assert np.allclose(np.asarray(ca_k), ca_r, rtol=1e-4, atol=1e-4)
    assert np.allclose(np.asarray(cd_k), cd_r, rtol=1e-4, atol=1e-4)

    # (c) SFB: small single-block and gridded
    lo_t = jax.random.normal(k5, (B, 1, 9), dtype=jnp.float32)
    hi_t = jax.random.normal(k6, (B, 1, 9), dtype=jnp.float32)
    sfb_k = sfb_pallas(lo_t, hi_t, rec_lo, rec_hi)
    sfb_r = _sfb_ref(lo_t, hi_t, rec_lo, rec_hi)
    assert np.allclose(np.asarray(sfb_k), sfb_r, rtol=1e-4, atol=1e-5)

    lo_b = jax.random.normal(k2, (3, 8, 40), dtype=jnp.float32)
    hi_b = jax.random.normal(k3, (3, 8, 40), dtype=jnp.float32)
    sfb_k = sfb_pallas(lo_b, hi_b, rec_lo, rec_hi, row_tile=8)
    sfb_r = _sfb_ref(lo_b, hi_b, rec_lo, rec_hi)
    assert np.allclose(np.asarray(sfb_k), sfb_r, rtol=1e-4, atol=1e-4)

    print("KERNEL_OK")
</pallas_src>

<mosaic_0001>
module attributes {stable_mosaic.version = 11 : i64} {
  func.func @_sfb_kernel(%arg0: i32, %arg1: memref<2x8xf32, #tpu.memory_space<vmem>>, %arg2: memref<2x8xf32, #tpu.memory_space<vmem>>, %arg3: memref<8xf32, #tpu.memory_space<smem>>, %arg4: memref<8xf32, #tpu.memory_space<smem>>, %arg5: memref<2x5xf32, #tpu.memory_space<vmem>>, %arg6: memref<2x5xf32, #tpu.memory_space<vmem>>) attributes {dimension_semantics = [#tpu.dimension_semantics<parallel>], iteration_bounds = array<i64: 1>, scalar_prefetch = 0 : i64, scratch_operands = 0 : i64, tpu.core_type = #tpu.core_type<tc>, window_params = [{transform_indices = @transform_0, window_bounds = array<i64: 2, 8>}, {transform_indices = @transform_1, window_bounds = array<i64: 2, 8>}, {transform_indices = @transform_2, window_bounds = array<i64: 8>}, {transform_indices = @transform_3, window_bounds = array<i64: 8>}, {transform_indices = @transform_4, window_bounds = array<i64: 2, 5>}, {transform_indices = @transform_5, window_bounds = array<i64: 2, 5>}]} {
    %c0 = arith.constant 0 : index
    %c0_0 = arith.constant 0 : index
    %0 = vector.load %arg1[%c0, %c0_0] : memref<2x8xf32, #tpu.memory_space<vmem>>, vector<2x8xf32>
    %c0_1 = arith.constant 0 : index
    %c0_2 = arith.constant 0 : index
    %1 = vector.load %arg2[%c0_1, %c0_2] : memref<2x8xf32, #tpu.memory_space<vmem>>, vector<2x8xf32>
    %c0_3 = arith.constant 0 : index
    %2 = memref.load %arg3[%c0_3] : memref<8xf32, #tpu.memory_space<smem>>
    %c1 = arith.constant 1 : index
    %3 = memref.load %arg3[%c1] : memref<8xf32, #tpu.memory_space<smem>>
    %c2 = arith.constant 2 : index
    %4 = memref.load %arg3[%c2] : memref<8xf32, #tpu.memory_space<smem>>
    %c3 = arith.constant 3 : index
    %5 = memref.load %arg3[%c3] : memref<8xf32, #tpu.memory_space<smem>>
    %c4 = arith.constant 4 : index
    %6 = memref.load %arg3[%c4] : memref<8xf32, #tpu.memory_space<smem>>
    %c5 = arith.constant 5 : index
    %7 = memref.load %arg3[%c5] : memref<8xf32, #tpu.memory_space<smem>>
    %c6 = arith.constant 6 : index
    %8 = memref.load %arg3[%c6] : memref<8xf32, #tpu.memory_space<smem>>
    %c7 = arith.constant 7 : index
    %9 = memref.load %arg3[%c7] : memref<8xf32, #tpu.memory_space<smem>>
    %c0_4 = arith.constant 0 : index
    %10 = memref.load %arg4[%c0_4] : memref<8xf32, #tpu.memory_space<smem>>
    %c1_5 = arith.constant 1 : index
    %11 = memref.load %arg4[%c1_5] : memref<8xf32, #tpu.memory_space<smem>>
    %c2_6 = arith.constant 2 : index
    %12 = memref.load %arg4[%c2_6] : memref<8xf32, #tpu.memory_space<smem>>
    %c3_7 = arith.constant 3 : index
    %13 = memref.load %arg4[%c3_7] : memref<8xf32, #tpu.memory_space<smem>>
    %c4_8 = arith.constant 4 : index
    %14 = memref.load %arg4[%c4_8] : memref<8xf32, #tpu.memory_space<smem>>
    %c5_9 = arith.constant 5 : index
    %15 = memref.load %arg4[%c5_9] : memref<8xf32, #tpu.memory_space<smem>>
    %c6_10 = arith.constant 6 : index
    %16 = memref.load %arg4[%c6_10] : memref<8xf32, #tpu.memory_space<smem>>
    %c7_11 = arith.constant 7 : index
    %17 = memref.load %arg4[%c7_11] : memref<8xf32, #tpu.memory_space<smem>>
    %cst = arith.constant 0.000000e+00 : f32
    %18 = vector.broadcast %cst : f32 to vector<2x5xf32>
    %cst_12 = arith.constant 0.000000e+00 : f32
    %19 = vector.broadcast %cst_12 : f32 to vector<2x5xf32>
    %20 = vector.extract_strided_slice %0 {offsets = [0, 3], sizes = [2, 5], strides = [1, 1]} : vector<2x8xf32> to vector<2x5xf32>
    %21 = vector.extract_strided_slice %1 {offsets = [0, 3], sizes = [2, 5], strides = [1, 1]} : vector<2x8xf32> to vector<2x5xf32>
    %22 = vector.broadcast %2 : f32 to vector<2x5xf32>
    %23 = arith.mulf %20, %22 : vector<2x5xf32>
    %24 = arith.addf %18, %23 : vector<2x5xf32>
    %25 = vector.broadcast %10 : f32 to vector<2x5xf32>
    %26 = arith.mulf %21, %25 : vector<2x5xf32>
    %27 = arith.addf %24, %26 : vector<2x5xf32>
    %28 = vector.broadcast %3 : f32 to vector<2x5xf32>
    %29 = arith.mulf %20, %28 : vector<2x5xf32>
    %30 = arith.addf %19, %29 : vector<2x5xf32>
    %31 = vector.broadcast %11 : f32 to vector<2x5xf32>
    %32 = arith.mulf %21, %31 : vector<2x5xf32>
    %33 = arith.addf %30, %32 : vector<2x5xf32>
    %34 = vector.extract_strided_slice %0 {offsets = [0, 2], sizes = [2, 5], strides = [1, 1]} : vector<2x8xf32> to vector<2x5xf32>
    %35 = vector.extract_strided_slice %1 {offsets = [0, 2], sizes = [2, 5], strides = [1, 1]} : vector<2x8xf32> to vector<2x5xf32>
    %36 = vector.broadcast %4 : f32 to vector<2x5xf32>
    %37 = arith.mulf %34, %36 : vector<2x5xf32>
    %38 = arith.addf %27, %37 : vector<2x5xf32>
    %39 = vector.broadcast %12 : f32 to vector<2x5xf32>
    %40 = arith.mulf %35, %39 : vector<2x5xf32>
    %41 = arith.addf %38, %40 : vector<2x5xf32>
    %42 = vector.broadcast %5 : f32 to vector<2x5xf32>
    %43 = arith.mulf %34, %42 : vector<2x5xf32>
    %44 = arith.addf %33, %43 : vector<2x5xf32>
    %45 = vector.broadcast %13 : f32 to vector<2x5xf32>
    %46 = arith.mulf %35, %45 : vector<2x5xf32>
    %47 = arith.addf %44, %46 : vector<2x5xf32>
    %48 = vector.extract_strided_slice %0 {offsets = [0, 1], sizes = [2, 5], strides = [1, 1]} : vector<2x8xf32> to vector<2x5xf32>
    %49 = vector.extract_strided_slice %1 {offsets = [0, 1], sizes = [2, 5], strides = [1, 1]} : vector<2x8xf32> to vector<2x5xf32>
    %50 = vector.broadcast %6 : f32 to vector<2x5xf32>
    %51 = arith.mulf %48, %50 : vector<2x5xf32>
    %52 = arith.addf %41, %51 : vector<2x5xf32>
    %53 = vector.broadcast %14 : f32 to vector<2x5xf32>
    %54 = arith.mulf %49, %53 : vector<2x5xf32>
    %55 = arith.addf %52, %54 : vector<2x5xf32>
    %56 = vector.broadcast %7 : f32 to vector<2x5xf32>
    %57 = arith.mulf %48, %56 : vector<2x5xf32>
    %58 = arith.addf %47, %57 : vector<2x5xf32>
    %59 = vector.broadcast %15 : f32 to vector<2x5xf32>
    %60 = arith.mulf %49, %59 : vector<2x5xf32>
    %61 = arith.addf %58, %60 : vector<2x5xf32>
    %62 = vector.extract_strided_slice %0 {offsets = [0, 0], sizes = [2, 5], strides = [1, 1]} : vector<2x8xf32> to vector<2x5xf32>
    %63 = vector.extract_strided_slice %1 {offsets = [0, 0], sizes = [2, 5], strides = [1, 1]} : vector<2x8xf32> to vector<2x5xf32>
    %64 = vector.broadcast %8 : f32 to vector<2x5xf32>
    %65 = arith.mulf %62, %64 : vector<2x5xf32>
    %66 = arith.addf %55, %65 : vector<2x5xf32>
    %67 = vector.broadcast %16 : f32 to vector<2x5xf32>
    %68 = arith.mulf %63, %67 : vector<2x5xf32>
    %69 = arith.addf %66, %68 : vector<2x5xf32>
    %70 = vector.broadcast %9 : f32 to vector<2x5xf32>
    %71 = arith.mulf %62, %70 : vector<2x5xf32>
    %72 = arith.addf %61, %71 : vector<2x5xf32>
    %73 = vector.broadcast %17 : f32 to vector<2x5xf32>
    %74 = arith.mulf %63, %73 : vector<2x5xf32>
    %75 = arith.addf %72, %74 : vector<2x5xf32>
    %c0_13 = arith.constant 0 : index
    %c0_14 = arith.constant 0 : index
    %76 = vector.load %arg5[%c0_13, %c0_14] : memref<2x5xf32, #tpu.memory_space<vmem>>, vector<2x5xf32>
    tpu.vector_store %arg5[%c0_13, %c0_14], %69 {strides = array<i32>} : memref<2x5xf32, #tpu.memory_space<vmem>>, vector<2x5xf32>,
    %c0_15 = arith.constant 0 : index
    %c0_16 = arith.constant 0 : index
    %77 = vector.load %arg6[%c0_15, %c0_16] : memref<2x5xf32, #tpu.memory_space<vmem>>, vector<2x5xf32>
    tpu.vector_store %arg6[%c0_15, %c0_16], %75 {strides = array<i32>} : memref<2x5xf32, #tpu.memory_space<vmem>>, vector<2x5xf32>,
    return
  }
  func.func @transform_0(%arg0: i32) -> (i32, i32) {
    %c0_i32 = arith.constant 0 : i32
    %c0_i32_0 = arith.constant 0 : i32
    return %arg0, %c0_i32 : i32, i32
  }
  func.func @transform_1(%arg0: i32) -> (i32, i32) {
    %c0_i32 = arith.constant 0 : i32
    %c0_i32_0 = arith.constant 0 : i32
    return %arg0, %c0_i32 : i32, i32
  }
  func.func @transform_2(%arg0: i32) -> i32 {
    %c0_i32 = arith.constant 0 : i32
    %c0_i32_0 = arith.constant 0 : i32
    return %c0_i32 : i32
  }
  func.func @transform_3(%arg0: i32) -> i32 {
    %c0_i32 = arith.constant 0 : i32
    %c0_i32_0 = arith.constant 0 : i32
    return %c0_i32 : i32
  }
  func.func @transform_4(%arg0: i32) -> (i32, i32) {
    %c0_i32 = arith.constant 0 : i32
    %c0_i32_0 = arith.constant 0 : i32
    return %arg0, %c0_i32 : i32, i32
  }
  func.func @transform_5(%arg0: i32) -> (i32, i32) {
    %c0_i32 = arith.constant 0 : i32
    %c0_i32_0 = arith.constant 0 : i32
    return %arg0, %c0_i32 : i32, i32
  }
}

module attributes {stable_mosaic.version = 11 : i64} {
  func.func @_sfb_kernel(%arg0: i32, %arg1: memref<2x9xf32, #tpu.memory_space<vmem>>, %arg2: memref<2x9xf32, #tpu.memory_space<vmem>>, %arg3: memref<8xf32, #tpu.memory_space<smem>>, %arg4: memref<8xf32, #tpu.memory_space<smem>>, %arg5: memref<2x6xf32, #tpu.memory_space<vmem>>, %arg6: memref<2x6xf32, #tpu.memory_space<vmem>>) attributes {dimension_semantics = [#tpu.dimension_semantics<parallel>], iteration_bounds = array<i64: 1>, scalar_prefetch = 0 : i64, scratch_operands = 0 : i64, tpu.core_type = #tpu.core_type<tc>, window_params = [{transform_indices = @transform_0, window_bounds = array<i64: 2, 9>}, {transform_indices = @transform_1, window_bounds = array<i64: 2, 9>}, {transform_indices = @transform_2, window_bounds = array<i64: 8>}, {transform_indices = @transform_3, window_bounds = array<i64: 8>}, {transform_indices = @transform_4, window_bounds = array<i64: 2, 6>}, {transform_indices = @transform_5, window_bounds = array<i64: 2, 6>}]} {
    %c0 = arith.constant 0 : index
    %c0_0 = arith.constant 0 : index
    %0 = vector.load %arg1[%c0, %c0_0] : memref<2x9xf32, #tpu.memory_space<vmem>>, vector<2x9xf32>
    %c0_1 = arith.constant 0 : index
    %c0_2 = arith.constant 0 : index
    %1 = vector.load %arg2[%c0_1, %c0_2] : memref<2x9xf32, #tpu.memory_space<vmem>>, vector<2x9xf32>
    %c0_3 = arith.constant 0 : index
    %2 = memref.load %arg3[%c0_3] : memref<8xf32, #tpu.memory_space<smem>>
    %c1 = arith.constant 1 : index
    %3 = memref.load %arg3[%c1] : memref<8xf32, #tpu.memory_space<smem>>
    %c2 = arith.constant 2 : index
    %4 = memref.load %arg3[%c2] : memref<8xf32, #tpu.memory_space<smem>>
    %c3 = arith.constant 3 : index
    %5 = memref.load %arg3[%c3] : memref<8xf32, #tpu.memory_space<smem>>
    %c4 = arith.constant 4 : index
    %6 = memref.load %arg3[%c4] : memref<8xf32, #tpu.memory_space<smem>>
    %c5 = arith.constant 5 : index
    %7 = memref.load %arg3[%c5] : memref<8xf32, #tpu.memory_space<smem>>
    %c6 = arith.constant 6 : index
    %8 = memref.load %arg3[%c6] : memref<8xf32, #tpu.memory_space<smem>>
    %c7 = arith.constant 7 : index
    %9 = memref.load %arg3[%c7] : memref<8xf32, #tpu.memory_space<smem>>
    %c0_4 = arith.constant 0 : index
    %10 = memref.load %arg4[%c0_4] : memref<8xf32, #tpu.memory_space<smem>>
    %c1_5 = arith.constant 1 : index
    %11 = memref.load %arg4[%c1_5] : memref<8xf32, #tpu.memory_space<smem>>
    %c2_6 = arith.constant 2 : index
    %12 = memref.load %arg4[%c2_6] : memref<8xf32, #tpu.memory_space<smem>>
    %c3_7 = arith.constant 3 : index
    %13 = memref.load %arg4[%c3_7] : memref<8xf32, #tpu.memory_space<smem>>
    %c4_8 = arith.constant 4 : index
    %14 = memref.load %arg4[%c4_8] : memref<8xf32, #tpu.memory_space<smem>>
    %c5_9 = arith.constant 5 : index
    %15 = memref.load %arg4[%c5_9] : memref<8xf32, #tpu.memory_space<smem>>
    %c6_10 = arith.constant 6 : index
    %16 = memref.load %arg4[%c6_10] : memref<8xf32, #tpu.memory_space<smem>>
    %c7_11 = arith.constant 7 : index
    %17 = memref.load %arg4[%c7_11] : memref<8xf32, #tpu.memory_space<smem>>
    %cst = arith.constant 0.000000e+00 : f32
    %18 = vector.broadcast %cst : f32 to vector<2x6xf32>
    %cst_12 = arith.constant 0.000000e+00 : f32
    %19 = vector.broadcast %cst_12 : f32 to vector<2x6xf32>
    %20 = vector.extract_strided_slice %0 {offsets = [0, 3], sizes = [2, 6], strides = [1, 1]} : vector<2x9xf32> to vector<2x6xf32>
    %21 = vector.extract_strided_slice %1 {offsets = [0, 3], sizes = [2, 6], strides = [1, 1]} : vector<2x9xf32> to vector<2x6xf32>
    %22 = vector.broadcast %2 : f32 to vector<2x6xf32>
    %23 = arith.mulf %20, %22 : vector<2x6xf32>
    %24 = arith.addf %18, %23 : vector<2x6xf32>
    %25 = vector.broadcast %10 : f32 to vector<2x6xf32>
    %26 = arith.mulf %21, %25 : vector<2x6xf32>
    %27 = arith.addf %24, %26 : vector<2x6xf32>
    %28 = vector.broadcast %3 : f32 to vector<2x6xf32>
    %29 = arith.mulf %20, %28 : vector<2x6xf32>
    %30 = arith.addf %19, %29 : vector<2x6xf32>
    %31 = vector.broadcast %11 : f32 to vector<2x6xf32>
    %32 = arith.mulf %21, %31 : vector<2x6xf32>
    %33 = arith.addf %30, %32 : vector<2x6xf32>
    %34 = vector.extract_strided_slice %0 {offsets = [0, 2], sizes = [2, 6], strides = [1, 1]} : vector<2x9xf32> to vector<2x6xf32>
    %35 = vector.extract_strided_slice %1 {offsets = [0, 2], sizes = [2, 6], strides = [1, 1]} : vector<2x9xf32> to vector<2x6xf32>
    %36 = vector.broadcast %4 : f32 to vector<2x6xf32>
    %37 = arith.mulf %34, %36 : vector<2x6xf32>
    %38 = arith.addf %27, %37 : vector<2x6xf32>
    %39 = vector.broadcast %12 : f32 to vector<2x6xf32>
    %40 = arith.mulf %35, %39 : vector<2x6xf32>
    %41 = arith.addf %38, %40 : vector<2x6xf32>
    %42 = vector.broadcast %5 : f32 to vector<2x6xf32>
    %43 = arith.mulf %34, %42 : vector<2x6xf32>
    %44 = arith.addf %33, %43 : vector<2x6xf32>
    %45 = vector.broadcast %13 : f32 to vector<2x6xf32>
    %46 = arith.mulf %35, %45 : vector<2x6xf32>
    %47 = arith.addf %44, %46 : vector<2x6xf32>
    %48 = vector.extract_strided_slice %0 {offsets = [0, 1], sizes = [2, 6], strides = [1, 1]} : vector<2x9xf32> to vector<2x6xf32>
    %49 = vector.extract_strided_slice %1 {offsets = [0, 1], sizes = [2, 6], strides = [1, 1]} : vector<2x9xf32> to vector<2x6xf32>
    %50 = vector.broadcast %6 : f32 to vector<2x6xf32>
    %51 = arith.mulf %48, %50 : vector<2x6xf32>
    %52 = arith.addf %41, %51 : vector<2x6xf32>
    %53 = vector.broadcast %14 : f32 to vector<2x6xf32>
    %54 = arith.mulf %49, %53 : vector<2x6xf32>
    %55 = arith.addf %52, %54 : vector<2x6xf32>
    %56 = vector.broadcast %7 : f32 to vector<2x6xf32>
    %57 = arith.mulf %48, %56 : vector<2x6xf32>
    %58 = arith.addf %47, %57 : vector<2x6xf32>
    %59 = vector.broadcast %15 : f32 to vector<2x6xf32>
    %60 = arith.mulf %49, %59 : vector<2x6xf32>
    %61 = arith.addf %58, %60 : vector<2x6xf32>
    %62 = vector.extract_strided_slice %0 {offsets = [0, 0], sizes = [2, 6], strides = [1, 1]} : vector<2x9xf32> to vector<2x6xf32>
    %63 = vector.extract_strided_slice %1 {offsets = [0, 0], sizes = [2, 6], strides = [1, 1]} : vector<2x9xf32> to vector<2x6xf32>
    %64 = vector.broadcast %8 : f32 to vector<2x6xf32>
    %65 = arith.mulf %62, %64 : vector<2x6xf32>
    %66 = arith.addf %55, %65 : vector<2x6xf32>
    %67 = vector.broadcast %16 : f32 to vector<2x6xf32>
    %68 = arith.mulf %63, %67 : vector<2x6xf32>
    %69 = arith.addf %66, %68 : vector<2x6xf32>
    %70 = vector.broadcast %9 : f32 to vector<2x6xf32>
    %71 = arith.mulf %62, %70 : vector<2x6xf32>
    %72 = arith.addf %61, %71 : vector<2x6xf32>
    %73 = vector.broadcast %17 : f32 to vector<2x6xf32>
    %74 = arith.mulf %63, %73 : vector<2x6xf32>
    %75 = arith.addf %72, %74 : vector<2x6xf32>
    %c0_13 = arith.constant 0 : index
    %c0_14 = arith.constant 0 : index
    %76 = vector.load %arg5[%c0_13, %c0_14] : memref<2x6xf32, #tpu.memory_space<vmem>>, vector<2x6xf32>
    tpu.vector_store %arg5[%c0_13, %c0_14], %69 {strides = array<i32>} : memref<2x6xf32, #tpu.memory_space<vmem>>, vector<2x6xf32>,
    %c0_15 = arith.constant 0 : index
    %c0_16 = arith.constant 0 : index
    %77 = vector.load %arg6[%c0_15, %c0_16] : memref<2x6xf32, #tpu.memory_space<vmem>>, vector<2x6xf32>
    tpu.vector_store %arg6[%c0_15, %c0_16], %75 {strides = array<i32>} : memref<2x6xf32, #tpu.memory_space<vmem>>, vector<2x6xf32>,
    return
  }
  func.func @transform_0(%arg0: i32) -> (i32, i32) {
    %c0_i32 = arith.constant 0 : i32
    %c0_i32_0 = arith.constant 0 : i32
    return %arg0, %c0_i32 : i32, i32
  }
  func.func @transform_1(%arg0: i32) -> (i32, i32) {
    %c0_i32 = arith.constant 0 : i32
    %c0_i32_0 = arith.constant 0 : i32
    return %arg0, %c0_i32 : i32, i32
  }
  func.func @transform_2(%arg0: i32) -> i32 {
    %c0_i32 = arith.constant 0 : i32
    %c0_i32_0 = arith.constant 0 : i32
    return %c0_i32 : i32
  }
  func.func @transform_3(%arg0: i32) -> i32 {
    %c0_i32 = arith.constant 0 : i32
    %c0_i32_0 = arith.constant 0 : i32
    return %c0_i32 : i32
  }
  func.func @transform_4(%arg0: i32) -> (i32, i32) {
    %c0_i32 = arith.constant 0 : i32
    %c0_i32_0 = arith.constant 0 : i32
    return %arg0, %c0_i32 : i32, i32
  }
  func.func @transform_5(%arg0: i32) -> (i32, i32) {
    %c0_i32 = arith.constant 0 : i32
    %c0_i32_0 = arith.constant 0 : i32
    return %arg0, %c0_i32 : i32, i32
  }
}

module attributes {stable_mosaic.version = 11 : i64} {
  func.func @_dwt_kernel(%arg0: i32, %arg1: memref<2x6xf32, #tpu.memory_space<vmem>>, %arg2: memref<2x6xf32, #tpu.memory_space<vmem>>, %arg3: memref<8xf32, #tpu.memory_space<smem>>, %arg4: memref<8xf32, #tpu.memory_space<smem>>, %arg5: memref<2x9xf32, #tpu.memory_space<vmem>>, %arg6: memref<2x9xf32, #tpu.memory_space<vmem>>, %arg7: memref<2x12xf32, #tpu.memory_space<vmem>>, %arg8: memref<2x12xf32, #tpu.memory_space<vmem>>) attributes {dimension_semantics = [#tpu.dimension_semantics<parallel>], iteration_bounds = array<i64: 1>, scalar_prefetch = 0 : i64, scratch_operands = 2 : i64, tpu.core_type = #tpu.core_type<tc>, window_params = [{transform_indices = @transform_0, window_bounds = array<i64: 2, 6>}, {transform_indices = @transform_1, window_bounds = array<i64: 2, 6>}, {transform_indices = @transform_2, window_bounds = array<i64: 8>}, {transform_indices = @transform_3, window_bounds = array<i64: 8>}, {transform_indices = @transform_4, window_bounds = array<i64: 2, 9>}, {transform_indices = @transform_5, window_bounds = array<i64: 2, 9>}]} {
    %c0 = arith.constant 0 : index
    %c0_0 = arith.constant 0 : index
    %0 = vector.load %arg1[%c0, %c0_0] : memref<2x6xf32, #tpu.memory_space<vmem>>, vector<2x6xf32>
    %c0_1 = arith.constant 0 : index
    %c0_2 = arith.constant 0 : index
    %1 = vector.load %arg2[%c0_1, %c0_2] : memref<2x6xf32, #tpu.memory_space<vmem>>, vector<2x6xf32>
    %c0_3 = arith.constant 0 : index
    %c3 = arith.constant 3 : index
    %2 = vector.load %arg7[%c0_3, %c3] : memref<2x12xf32, #tpu.memory_space<vmem>>, vector<2x6xf32>
    tpu.vector_store %arg7[%c0_3, %c3], %0 {strides = array<i32>} : memref<2x12xf32, #tpu.memory_space<vmem>>, vector<2x6xf32>,
    %c0_4 = arith.constant 0 : index
    %c3_5 = arith.constant 3 : index
    %3 = vector.load %arg8[%c0_4, %c3_5] : memref<2x12xf32, #tpu.memory_space<vmem>>, vector<2x6xf32>
    tpu.vector_store %arg8[%c0_4, %c3_5], %1 {strides = array<i32>} : memref<2x12xf32, #tpu.memory_space<vmem>>, vector<2x6xf32>,
    %4 = vector.extract_strided_slice %1 {offsets = [0, 2], sizes = [2, 1], strides = [1, 1]} : vector<2x6xf32> to vector<2x1xf32>
    %c0_6 = arith.constant 0 : index
    %c0_7 = arith.constant 0 : index
    %5 = vector.load %arg7[%c0_6, %c0_7] : memref<2x12xf32, #tpu.memory_space<vmem>>, vector<2x1xf32>
    tpu.vector_store %arg7[%c0_6, %c0_7], %4 {strides = array<i32>} : memref<2x12xf32, #tpu.memory_space<vmem>>, vector<2x1xf32>,
    %6 = vector.extract_strided_slice %0 {offsets = [0, 2], sizes = [2, 1], strides = [1, 1]} : vector<2x6xf32> to vector<2x1xf32>
    %c0_8 = arith.constant 0 : index
    %c0_9 = arith.constant 0 : index
    %7 = vector.load %arg8[%c0_8, %c0_9] : memref<2x12xf32, #tpu.memory_space<vmem>>, vector<2x1xf32>
    tpu.vector_store %arg8[%c0_8, %c0_9], %6 {strides = array<i32>} : memref<2x12xf32, #tpu.memory_space<vmem>>, vector<2x1xf32>,
    %8 = vector.extract_strided_slice %1 {offsets = [0, 1], sizes = [2, 1], strides = [1, 1]} : vector<2x6xf32> to vector<2x1xf32>
    %c0_10 = arith.constant 0 : index
    %c1 = arith.constant 1 : index
    %9 = vector.load %arg7[%c0_10, %c1] : memref<2x12xf32, #tpu.memory_space<vmem>>, vector<2x1xf32>
    tpu.vector_store %arg7[%c0_10, %c1], %8 {strides = array<i32>} : memref<2x12xf32, #tpu.memory_space<vmem>>, vector<2x1xf32>,
    %10 = vector.extract_strided_slice %0 {offsets = [0, 1], sizes = [2, 1], strides = [1, 1]} : vector<2x6xf32> to vector<2x1xf32>
    %c0_11 = arith.constant 0 : index
    %c1_12 = arith.constant 1 : index
    %11 = vector.load %arg8[%c0_11, %c1_12] : memref<2x12xf32, #tpu.memory_space<vmem>>, vector<2x1xf32>
    tpu.vector_store %arg8[%c0_11, %c1_12], %10 {strides = array<i32>} : memref<2x12xf32, #tpu.memory_space<vmem>>, vector<2x1xf32>,
    %12 = vector.extract_strided_slice %1 {offsets = [0, 0], sizes = [2, 1], strides = [1, 1]} : vector<2x6xf32> to vector<2x1xf32>
    %c0_13 = arith.constant 0 : index
    %c2 = arith.constant 2 : index
    %13 = vector.load %arg7[%c0_13, %c2] : memref<2x12xf32, #tpu.memory_space<vmem>>, vector<2x1xf32>
    tpu.vector_store %arg7[%c0_13, %c2], %12 {strides = array<i32>} : memref<2x12xf32, #tpu.memory_space<vmem>>, vector<2x1xf32>,
    %14 = vector.extract_strided_slice %0 {offsets = [0, 0], sizes = [2, 1], strides = [1, 1]} : vector<2x6xf32> to vector<2x1xf32>
    %c0_14 = arith.constant 0 : index
    %c2_15 = arith.constant 2 : index
    %15 = vector.load %arg8[%c0_14, %c2_15] : memref<2x12xf32, #tpu.memory_space<vmem>>, vector<2x1xf32>
    tpu.vector_store %arg8[%c0_14, %c2_15], %14 {strides = array<i32>} : memref<2x12xf32, #tpu.memory_space<vmem>>, vector<2x1xf32>,
    %16 = vector.extract_strided_slice %1 {offsets = [0, 5], sizes = [2, 1], strides = [1, 1]} : vector<2x6xf32> to vector<2x1xf32>
    %c0_16 = arith.constant 0 : index
    %c9 = arith.constant 9 : index
    %17 = vector.load %arg7[%c0_16, %c9] : memref<2x12xf32, #tpu.memory_space<vmem>>, vector<2x1xf32>
    tpu.vector_store %arg7[%c0_16, %c9], %16 {strides = array<i32>} : memref<2x12xf32, #tpu.memory_space<vmem>>, vector<2x1xf32>,
    %18 = vector.extract_strided_slice %1 {offsets = [0, 4], sizes = [2, 1], strides = [1, 1]} : vector<2x6xf32> to vector<2x1xf32>
    %c0_17 = arith.constant 0 : index
    %c10 = arith.constant 10 : index
    %19 = vector.load %arg7[%c0_17, %c10] : memref<2x12xf32, #tpu.memory_space<vmem>>, vector<2x1xf32>
    tpu.vector_store %arg7[%c0_17, %c10], %18 {strides = array<i32>} : memref<2x12xf32, #tpu.memory_space<vmem>>, vector<2x1xf32>,
    %20 = vector.extract_strided_slice %1 {offsets = [0, 3], sizes = [2, 1], strides = [1, 1]} : vector<2x6xf32> to vector<2x1xf32>
    %c0_18 = arith.constant 0 : index
    %c11 = arith.constant 11 : index
    %21 = vector.load %arg7[%c0_18, %c11] : memref<2x12xf32, #tpu.memory_space<vmem>>, vector<2x1xf32>
    tpu.vector_store %arg7[%c0_18, %c11], %20 {strides = array<i32>} : memref<2x12xf32, #tpu.memory_space<vmem>>, vector<2x1xf32>,
    %22 = vector.extract_strided_slice %0 {offsets = [0, 5], sizes = [2, 1], strides = [1, 1]} : vector<2x6xf32> to vector<2x1xf32>
    %c0_19 = arith.constant 0 : index
    %c9_20 = arith.constant 9 : index
    %23 = vector.load %arg8[%c0_19, %c9_20] : memref<2x12xf32, #tpu.memory_space<vmem>>, vector<2x1xf32>
    tpu.vector_store %arg8[%c0_19, %c9_20], %22 {strides = array<i32>} : memref<2x12xf32, #tpu.memory_space<vmem>>, vector<2x1xf32>,
    %24 = vector.extract_strided_slice %0 {offsets = [0, 4], sizes = [2, 1], strides = [1, 1]} : vector<2x6xf32> to vector<2x1xf32>
    %c0_21 = arith.constant 0 : index
    %c10_22 = arith.constant 10 : index
    %25 = vector.load %arg8[%c0_21, %c10_22] : memref<2x12xf32, #tpu.memory_space<vmem>>, vector<2x1xf32>
    tpu.vector_store %arg8[%c0_21, %c10_22], %24 {strides = array<i32>} : memref<2x12xf32, #tpu.memory_space<vmem>>, vector<2x1xf32>,
    %26 = vector.extract_strided_slice %0 {offsets = [0, 3], sizes = [2, 1], strides = [1, 1]} : vector<2x6xf32> to vector<2x1xf32>
    %c0_23 = arith.constant 0 : index
    %c11_24 = arith.constant 11 : index
    %27 = vector.load %arg8[%c0_23, %c11_24] : memref<2x12xf32, #tpu.memory_space<vmem>>, vector<2x1xf32>
    tpu.vector_store %arg8[%c0_23, %c11_24], %26 {strides = array<i32>} : memref<2x12xf32, #tpu.memory_space<vmem>>, vector<2x1xf32>,
    %c0_25 = arith.constant 0 : index
    %c0_26 = arith.constant 0 : index
    %28 = vector.load %arg7[%c0_25, %c0_26] : memref<2x12xf32, #tpu.memory_space<vmem>>, vector<2x12xf32>
    %c0_27 = arith.constant 0 : index
    %c0_28 = arith.constant 0 : index
    %29 = vector.load %arg8[%c0_27, %c0_28] : memref<2x12xf32, #tpu.memory_space<vmem>>, vector<2x12xf32>
    %c0_29 = arith.constant 0 : index
    %30 = memref.load %arg3[%c0_29] : memref<8xf32, #tpu.memory_space<smem>>
    %c1_30 = arith.constant 1 : index
    %31 = memref.load %arg3[%c1_30] : memref<8xf32, #tpu.memory_space<smem>>
    %c2_31 = arith.constant 2 : index
    %32 = memref.load %arg3[%c2_31] : memref<8xf32, #tpu.memory_space<smem>>
    %c3_32 = arith.constant 3 : index
    %33 = memref.load %arg3[%c3_32] : memref<8xf32, #tpu.memory_space<smem>>
    %c4 = arith.constant 4 : index
    %34 = memref.load %arg3[%c4] : memref<8xf32, #tpu.memory_space<smem>>
    %c5 = arith.constant 5 : index
    %35 = memref.load %arg3[%c5] : memref<8xf32, #tpu.memory_space<smem>>
    %c6 = arith.constant 6 : index
    %36 = memref.load %arg3[%c6] : memref<8xf32, #tpu.memory_space<smem>>
    %c7 = arith.constant 7 : index
    %37 = memref.load %arg3[%c7] : memref<8xf32, #tpu.memory_space<smem>>
    %c0_33 = arith.constant 0 : index
    %38 = memref.load %arg4[%c0_33] : memref<8xf32, #tpu.memory_space<smem>>
    %c1_34 = arith.constant 1 : index
    %39 = memref.load %arg4[%c1_34] : memref<8xf32, #tpu.memory_space<smem>>
    %c2_35 = arith.constant 2 : index
    %40 = memref.load %arg4[%c2_35] : memref<8xf32, #tpu.memory_space<smem>>
    %c3_36 = arith.constant 3 : index
    %41 = memref.load %arg4[%c3_36] : memref<8xf32, #tpu.memory_space<smem>>
    %c4_37 = arith.constant 4 : index
    %42 = memref.load %arg4[%c4_37] : memref<8xf32, #tpu.memory_space<smem>>
    %c5_38 = arith.constant 5 : index
    %43 = memref.load %arg4[%c5_38] : memref<8xf32, #tpu.memory_space<smem>>
    %c6_39 = arith.constant 6 : index
    %44 = memref.load %arg4[%c6_39] : memref<8xf32, #tpu.memory_space<smem>>
    %c7_40 = arith.constant 7 : index
    %45 = memref.load %arg4[%c7_40] : memref<8xf32, #tpu.memory_space<smem>>
    %cst = arith.constant 0.000000e+00 : f32
    %46 = vector.broadcast %cst : f32 to vector<2x9xf32>
    %cst_41 = arith.constant 0.000000e+00 : f32
    %47 = vector.broadcast %cst_41 : f32 to vector<2x9xf32>
    %48 = vector.extract_strided_slice %28 {offsets = [0, 0], sizes = [2, 9], strides = [1, 1]} : vector<2x12xf32> to vector<2x9xf32>
    %49 = vector.extract_strided_slice %29 {offsets = [0, 0], sizes = [2, 9], strides = [1, 1]} : vector<2x12xf32> to vector<2x9xf32>
    %50 = vector.broadcast %30 : f32 to vector<2x9xf32>
    %51 = arith.mulf %48, %50 : vector<2x9xf32>
    %52 = arith.addf %46, %51 : vector<2x9xf32>
    %53 = vector.broadcast %31 : f32 to vector<2x9xf32>
    %54 = arith.mulf %49, %53 : vector<2x9xf32>
    %55 = arith.addf %52, %54 : vector<2x9xf32>
    %56 = vector.broadcast %38 : f32 to vector<2x9xf32>
    %57 = arith.mulf %48, %56 : vector<2x9xf32>
    %58 = arith.addf %47, %57 : vector<2x9xf32>
    %59 = vector.broadcast %39 : f32 to vector<2x9xf32>
    %60 = arith.mulf %49, %59 : vector<2x9xf32>
    %61 = arith.addf %58, %60 : vector<2x9xf32>
    %62 = vector.extract_strided_slice %28 {offsets = [0, 1], sizes = [2, 9], strides = [1, 1]} : vector<2x12xf32> to vector<2x9xf32>
    %63 = vector.extract_strided_slice %29 {offsets = [0, 1], sizes = [2, 9], strides = [1, 1]} : vector<2x12xf32> to vector<2x9xf32>
    %64 = vector.broadcast %32 : f32 to vector<2x9xf32>
    %65 = arith.mulf %62, %64 : vector<2x9xf32>
    %66 = arith.addf %55, %65 : vector<2x9xf32>
    %67 = vector.broadcast %33 : f32 to vector<2x9xf32>
    %68 = arith.mulf %63, %67 : vector<2x9xf32>
    %69 = arith.addf %66, %68 : vector<2x9xf32>
    %70 = vector.broadcast %40 : f32 to vector<2x9xf32>
    %71 = arith.mulf %62, %70 : vector<2x9xf32>
    %72 = arith.addf %61, %71 : vector<2x9xf32>
    %73 = vector.broadcast %41 : f32 to vector<2x9xf32>
    %74 = arith.mulf %63, %73 : vector<2x9xf32>
    %75 = arith.addf %72, %74 : vector<2x9xf32>
    %76 = vector.extract_strided_slice %28 {offsets = [0, 2], sizes = [2, 9], strides = [1, 1]} : vector<2x12xf32> to vector<2x9xf32>
    %77 = vector.extract_strided_slice %29 {offsets = [0, 2], sizes = [2, 9], strides = [1, 1]} : vector<2x12xf32> to vector<2x9xf32>
    %78 = vector.broadcast %34 : f32 to vector<2x9xf32>
    %79 = arith.mulf %76, %78 : vector<2x9xf32>
    %80 = arith.addf %69, %79 : vector<2x9xf32>
    %81 = vector.broadcast %35 : f32 to vector<2x9xf32>
    %82 = arith.mulf %77, %81 : vector<2x9xf32>
    %83 = arith.addf %80, %82 : vector<2x9xf32>
    %84 = vector.broadcast %42 : f32 to vector<2x9xf32>
    %85 = arith.mulf %76, %84 : vector<2x9xf32>
    %86 = arith.addf %75, %85 : vector<2x9xf32>
    %87 = vector.broadcast %43 : f32 to vector<2x9xf32>
    %88 = arith.mulf %77, %87 : vector<2x9xf32>
    %89 = arith.addf %86, %88 : vector<2x9xf32>
    %90 = vector.extract_strided_slice %28 {offsets = [0, 3], sizes = [2, 9], strides = [1, 1]} : vector<2x12xf32> to vector<2x9xf32>
    %91 = vector.extract_strided_slice %29 {offsets = [0, 3], sizes = [2, 9], strides = [1, 1]} : vector<2x12xf32> to vector<2x9xf32>
    %92 = vector.broadcast %36 : f32 to vector<2x9xf32>
    %93 = arith.mulf %90, %92 : vector<2x9xf32>
    %94 = arith.addf %83, %93 : vector<2x9xf32>
    %95 = vector.broadcast %37 : f32 to vector<2x9xf32>
    %96 = arith.mulf %91, %95 : vector<2x9xf32>
    %97 = arith.addf %94, %96 : vector<2x9xf32>
    %98 = vector.broadcast %44 : f32 to vector<2x9xf32>
    %99 = arith.mulf %90, %98 : vector<2x9xf32>
    %100 = arith.addf %89, %99 : vector<2x9xf32>
    %101 = vector.broadcast %45 : f32 to vector<2x9xf32>
    %102 = arith.mulf %91, %101 : vector<2x9xf32>
    %103 = arith.addf %100, %102 : vector<2x9xf32>
    %c0_42 = arith.constant 0 : index
    %c0_43 = arith.constant 0 : index
    %104 = vector.load %arg5[%c0_42, %c0_43] : memref<2x9xf32, #tpu.memory_space<vmem>>, vector<2x9xf32>
    tpu.vector_store %arg5[%c0_42, %c0_43], %97 {strides = array<i32>} : memref<2x9xf32, #tpu.memory_space<vmem>>, vector<2x9xf32>,
    %c0_44 = arith.constant 0 : index
    %c0_45 = arith.constant 0 : index
    %105 = vector.load %arg6[%c0_44, %c0_45] : memref<2x9xf32, #tpu.memory_space<vmem>>, vector<2x9xf32>
    tpu.vector_store %arg6[%c0_44, %c0_45], %103 {strides = array<i32>} : memref<2x9xf32, #tpu.memory_space<vmem>>, vector<2x9xf32>,
    return
  }
  func.func @transform_0(%arg0: i32) -> (i32, i32) {
    %c0_i32 = arith.constant 0 : i32
    %c0_i32_0 = arith.constant 0 : i32
    return %arg0, %c0_i32 : i32, i32
  }
  func.func @transform_1(%arg0: i32) -> (i32, i32) {
    %c0_i32 = arith.constant 0 : i32
    %c0_i32_0 = arith.constant 0 : i32
    return %arg0, %c0_i32 : i32, i32
  }
  func.func @transform_2(%arg0: i32) -> i32 {
    %c0_i32 = arith.constant 0 : i32
    %c0_i32_0 = arith.constant 0 : i32
    return %c0_i32 : i32
  }
  func.func @transform_3(%arg0: i32) -> i32 {
    %c0_i32 = arith.constant 0 : i32
    %c0_i32_0 = arith.constant 0 : i32
    return %c0_i32 : i32
  }
  func.func @transform_4(%arg0: i32) -> (i32, i32) {
    %c0_i32 = arith.constant 0 : i32
    %c0_i32_0 = arith.constant 0 : i32
    return %arg0, %c0_i32 : i32, i32
  }
  func.func @transform_5(%arg0: i32) -> (i32, i32) {
    %c0_i32 = arith.constant 0 : i32
    %c0_i32_0 = arith.constant 0 : i32
    return %arg0, %c0_i32 : i32, i32
  }
}

</mosaic_0001>

<bundles_post_ra>
// kernel: reverse.2
= control target key start
LH: loop header
LB: loop body
LE: loop exit
PB: predicated region body
PF: predicated region fallthrough
CT: control target
= control target key end

     0   :  { %v2_v0 = vlaneseq  ;;  %s123_s0 = inlined_call_operand.vmem [shape: f32[8], index: 0, kind: input, shape index: {}]   ;;  %s124_s1 = inlined_call_operand.vmem [shape: f32[8], index: 1, kind: output, shape index: {}]  }
   0x2   :  { %v3_v1 = vsub.s32 7, %v2_v0 }
   0x4   :  { %4 = vset.pattern.permute.xlu0 %v3_v1 }
   0x5   :  { %v43_v2 = vld [vmem:[#allocation1] sm:$0x1]  ;;  %v21_v3 = vld [vmem:[%s123_s0] sm:$0x1]  ;;  %v58_v10 = vshrl.u32 %v2_v0, 7 }
   0x6   :  { %44 = vst [vmem:[#allocation0] sm:$0x1] %v43_v2  ;;  %22 = vst [vmem:[#allocation1 + $0x1] sm:$0x1] %v21_v3 }
   0x7   :  { %vm59_vm0 = vcmp.lt.s32.totalorder %v58_v10, 1 }
   0xd   :  { %v46_v4 = vld [vmem:[#allocation0 + $0x7] ss:$-1 sm:$0xff]  ;;  %v40_v5 = vld [vmem:[#allocation1 + $0x1] sm:$0x1] }
   0xe   :  { %v47_v6 = vrot.slane %v46_v4, 7  ;;  %42 = vst [vmem:[#allocation0 + $0x8] sm:$0x1] %v40_v5 }
  0x10   :  { %48 = vperm.xlu0 %4, %v47_v6  }
  0x15   :  { %v53_v7 = vld [vmem:[#allocation0 + $0xf] ss:$-1 sm:$0xff] }
  0x16   :  { %v54_v8 = vrot.slane %v53_v7, 7 }
  0x18   :  { %55 = vperm.xlu0 %4, %v54_v8  }
  0x8f   :  { %v49_v9 = vpop.permute.xlu0 %48 }
  0x90   :  { %50 = vst [vmem:[#allocation2] sm:$0xff] %v49_v9 }
  0x97   :  { %v56_v11 = vpop.permute.xlu0 %55 }
  0x98   :  { %60 = vst.msk [vmem:[#allocation2] sm:$0xff] %vm59_vm0, %v56_v11 }
  0x9f   :  { %v64_v12 = vld [vmem:[#allocation2] sm:$0x1] }
  0xa0   :  { %66 = vst [vmem:[#allocation3] sm:$0x1] %v64_v12 }
  0xa7   :  { %v82_v13 = vld [vmem:[#allocation3] sm:$0x1] }
  0xa8   :  { %83 = vst [vmem:[%s124_s1] sm:$0x1] %v82_v13 }

// kernel: neg.1
= control target key start
LH: loop header
LB: loop body
LE: loop exit
PB: predicated region body
PF: predicated region fallthrough
CT: control target
= control target key end

     0   :  { %s24_s0 = inlined_call_operand.vmem [shape: f32[4], index: 0, kind: input, shape index: {}]   ;;  %s25_s1 = inlined_call_operand.vmem [shape: f32[4], index: 1, kind: output, shape index: {}]  }
   0x1   :  { %v2_v0 = vld [vmem:[%s24_s0] sm:$0x1] }
   0x2   :  { %v5_v1 = vxor.u32 2147483648, %v2_v0 }
   0x4   :  { %7 = vst [vmem:[%s25_s1] sm:$0x1] %v5_v1 }

// kernel: wavelet_dwt_layer_forward.5
= control target key start
LH: loop header
LB: loop body
LE: loop exit
PB: predicated region body
PF: predicated region fallthrough
CT: control target
= control target key end

     0   :  { %11 = vsyncpa [#allocation3], 0  ;;  %s287_s0 = inlined_call_operand.vmem [shape: f32[2,9], index: 0, kind: input, shape index: {}]   ;;  %s288_s1 = inlined_call_operand.vmem [shape: f32[2,9], index: 1, kind: input, shape index: {}]   ;;  %s289_s2 = inlined_call_operand.vmem [shape: f32[8], index: 2, kind: input, shape index: {}]   ;;  %s290_s3 = inlined_call_operand.vmem [shape: f32[8], index: 3, kind: input, shape index: {}]   ;;  %s291_s4 = inlined_call_operand.vmem [shape: f32[2,6], index: 4, kind: output, shape index: {0}]   ;;  %s292_s5 = inlined_call_operand.vmem [shape: f32[2,6], index: 5, kind: output, shape index: {1}]  }
   0x1   :  { %s23_s20 = sshll.u32 %s289_s2, 4  ;;  %s24_s20 = int_to_ptr.vmem [resolvable:$true] %s23_s20 }
   0x2   :  { %12 = vsyncpa [#allocation5], 0  ;;  %s33_s23 = sshll.u32 %s290_s3, 4  ;;  %s199_s24 = scalar_lea.vmem %s24_s20, 16  ;;  %s34_s23 = int_to_ptr.vmem [resolvable:$true] %s33_s23 }
   0x3   :  { %p200_p0 = scmp.ne.s32.totalorder %s24_s20, %s199_s24  ;;  %p204_p1 = scmp.lt.s32.totalorder %s24_s20, %s24_s20 }
   0x4   :  { %p205_p2 = scmp.lt.s32.totalorder %s199_s24, %s199_s24 }
   0x6   :  { %p206_p3 = por %p205_p2, %p204_p1 }
   0x8   :  { %p207_p4 = pnand %p206_p3, %p200_p0 }
   0xa   :  { %210 = shalt.err (!%p207_p4)
}
   0xb   :  { %s227_s25 = smov [#allocation2]   ;;  %s211_s26 = scalar_lea.vmem %s34_s23, 16 }
   0xc   :  { %26 = dma.vmem_to_smem %s24_s20, 16, %s227_s25, [#allocation3]  }
   0xd   :  { %p212_p5 = scmp.ne.s32.totalorder %s34_s23, %s211_s26  ;;  %p216_p6 = scmp.lt.s32.totalorder %s34_s23, %s34_s23 }
   0xe   :  { %p217_p7 = scmp.lt.s32.totalorder %s211_s26, %s211_s26 }
  0x10   :  { %p218_p8 = por %p217_p7, %p216_p6 }
  0x12   :  { %p219_p9 = pnand %p218_p8, %p212_p5 }
  0x14   :  { %222 = shalt.err (!%p219_p9)
}
  0x15   :  { %s228_s2 = smov [#allocation4]  }
  0x16   :  { %36 = dma.vmem_to_smem %s34_s23, 16, %s228_s2, [#allocation5]  }
  0x17   :  { %223 = dma.done.wait [#allocation3], 16  }
  0x18   :  { %224 = vsyncadd [#allocation3], 4294967280 }
  0x19   :  { %225 = dma.done.wait [#allocation5], 16  }
  0x1a   :  { %226 = vsyncadd [#allocation5], 4294967280 }
  0x1b   :  { %43 = sfence }
  0x1c   :  { %s187_s3 = sld [smem:[#allocation4 + $0x2]]  ;;  %s188_s28 = sld [smem:[#allocation4 + $0x3]]  ;;  %v45_v0 = vld [vmem:[%s288_s1] sm:$0x3]  ;;  %vm162_vm0 = vcmask 41984  }
  0x1d   :  { %s180_s27 = sld [smem:[#allocation2 + $0x2]]  ;;  %s181_s29 = sld [smem:[#allocation2 + $0x3]]  ;;  %v44_v1 = vld [vmem:[%s287_s0] sm:$0x3] }
  0x1e   :  { %s183_s30 = sld [smem:[#allocation2 + $0x5]]  ;;  %s182_s6 = sld [smem:[#allocation2 + $0x4]] }
  0x1f   :  { %s275_s11 = sld [smem:[#allocation4 + $0x5]]  ;;  %s277_s12 = sld [smem:[#allocation4 + $0x4]] }
  0x20   :  { %s46_s13 = sld [smem:[#allocation2]]  ;;  %s179_s15 = sld [smem:[#allocation2 + $0x1]] }
  0x21   :  { %s54_s14 = sld [smem:[#allocation4]]  ;;  %s229_s16 = smov 1  }
  0x22   :  { %v81_v2 = vstv %s187_s3  ;;  %v95_v5 = vstv %s188_s28  ;;  %s186_s1 = sld [smem:[#allocation4 + $0x1]]  ;;  %s185_s0 = sld [smem:[#allocation2 + $0x7]] }
  0x23   :  { %v82_v3 = vmul.f32 %v81_v2, %v45_v0  ;;  %v74_v4 = vstv %s180_s27  ;;  %v88_v7 = vstv %s181_s29  ;;  %v96_v8 = vmul.f32 %v95_v5, %v45_v0  ;;  %s184_s17 = sld [smem:[#allocation2 + $0x6]]  ;;  %s192_s18 = sld [smem:[#allocation4 + $0x7]] }
  0x24   :  { %v75_v6 = vmul.f32 %v74_v4, %v44_v1  ;;  %v89_v9 = vmul.f32 %v88_v7, %v44_v1  ;;  %v116_v10 = vstv %s183_s30  ;;  %v102_v11 = vstv %s182_s6  ;;  %s191_s19 = sld [smem:[#allocation4 + $0x6]]  ;;  %s230_s20 = smov 2  }
  0x25   :  { %84 = vrot.lane.b32.xlu1 %v82_v3, %s229_s16  ;;  %v117_v12 = vmul.f32 %v116_v10, %v44_v1  ;;  %v103_v13 = vmul.f32 %v102_v11, %v44_v1  ;;  %v123_v15 = vstv %s275_s11  ;;  %v109_v19 = vstv %s277_s12  ;;  %s231_s21 = smov 3   ;;  %s232_s22 = smov 125  }
  0x26   :  { %77 = vrot.lane.b32.xlu0 %v75_v6, %s229_s16  ;;  %v62_v14 = vstv %s46_s13  ;;  %v68_v18 = vstv %s179_s15  ;;  %v124_v24 = vmul.f32 %v123_v15, %v45_v0  ;;  %v110_v26 = vmul.f32 %v109_v19, %v45_v0 }
  0x27   :  { %v65_v16 = vstv %s54_s14  ;;  %v63_v17 = vmul.f32 %v62_v14, %v44_v1  ;;  %v69_v22 = vmul.f32 %v68_v18, %v44_v1 }
  0x28   :  { %v66_v20 = vmul.f32 %v65_v16, %v45_v0  ;;  %v71_v21 = vstv %s186_s1  ;;  %v144_v27 = vstv %s185_s0 }
  0x29   :  { %98 = vrot.lane.b32.xlu1 %v96_v8, %s229_s16  ;;  %v72_v23 = vmul.f32 %v71_v21, %v45_v0  ;;  %v130_v29 = vstv %s184_s17  ;;  %v145_v30 = vmul.f32 %v144_v27, %v44_v1  ;;  %v151_v32 = vstv %s192_s18 }
  0x2a   :  { %91 = vrot.lane.b32.xlu0 %v89_v9, %s229_s16  ;;  %v67_v25 = vadd.f32 %v66_v20, %v63_v17  ;;  %v131_v31 = vmul.f32 %v130_v29, %v44_v1  ;;  %v137_v33 = vstv %s191_s19  ;;  %v152_v34 = vmul.f32 %v151_v32, %v45_v0 }
  0x2b   :  { %v73_v28 = vadd.f32 %v72_v23, %v69_v22  ;;  %v138_v35 = vmul.f32 %v137_v33, %v45_v0 }
  0x2d   :  { %119 = vrot.lane.b32.xlu1 %v117_v12, %s230_s20 }
  0x2e   :  { %105 = vrot.lane.b32.xlu0 %v103_v13, %s230_s20 }
  0x31   :  { %126 = vrot.lane.b32.xlu1 %v124_v24, %s230_s20 }
  0x32   :  { %112 = vrot.lane.b32.xlu0 %v110_v26, %s230_s20 }
  0x35   :  { %147 = vrot.lane.b32.xlu1 %v145_v30, %s231_s21 }
  0x36   :  { %133 = vrot.lane.b32.xlu0 %v131_v31, %s231_s21 }
  0x39   :  { %154 = vrot.lane.b32.xlu1 %v152_v34, %s231_s21 }
  0x3a   :  { %140 = vrot.lane.b32.xlu0 %v138_v35, %s231_s21 }
  0x97   :  { %v85_v36 = vpop.permute.xlu1 %84 }
  0x98   :  { %v78_v37 = vpop.permute.xlu0 %77 }
  0x99   :  { %v80_v43 = vadd.f32 %v78_v37, %v67_v25 }
  0x9b   :  { %v99_v38 = vpop.permute.xlu1 %98  ;;  %v87_v47 = vadd.f32 %v85_v36, %v80_v43 }
  0x9c   :  { %v92_v39 = vpop.permute.xlu0 %91 }
  0x9d   :  { %v94_v40 = vadd.f32 %v92_v39, %v73_v28 }
  0x9f   :  { %v120_v41 = vpop.permute.xlu1 %119  ;;  %v101_v44 = vadd.f32 %v99_v38, %v94_v40 }
  0xa0   :  { %v106_v42 = vpop.permute.xlu0 %105 }
  0xa1   :  { %v122_v48 = vadd.f32 %v120_v41, %v101_v44  ;;  %v108_v49 = vadd.f32 %v106_v42, %v87_v47 }
  0xa3   :  { %v127_v45 = vpop.permute.xlu1 %126 }
  0xa4   :  { %v113_v46 = vpop.permute.xlu0 %112  ;;  %v129_v51 = vadd.f32 %v127_v45, %v122_v48 }
  0xa5   :  { %v115_v53 = vadd.f32 %v113_v46, %v108_v49 }
  0xa7   :  { %v148_v50 = vpop.permute.xlu1 %147 }
  0xa8   :  { %v134_v52 = vpop.permute.xlu0 %133  ;;  %v150_v54 = vadd.f32 %v148_v50, %v129_v51 }
  0xa9   :  { %v136_v55 = vadd.f32 %v134_v52, %v115_v53 }
  0xab   :  { %v155_v56 = vpop.permute.xlu1 %154 }
  0xac   :  { %v157_v57 = vadd.f32 %v155_v56, %v150_v54  ;;  %v141_v58 = vpop.permute.xlu0 %140 }
  0xad   :  { %v143_v59 = vadd.f32 %v141_v58, %v136_v55 }
  0xae   :  { %165 = vrot.lane.b32.xlu1 %v157_v57, %s232_s22 }
  0xaf   :  { %159 = vrot.lane.b32.xlu0 %v143_v59, %s232_s22 }
 0x120   :  { %v166_v60 = vpop.permute.xlu1 %165 }
 0x121   :  { %168 = vst.msk [vmem:[%s292_s5] sm:$0x3] %vm162_vm0, %v166_v60  ;;  %v160_v61 = vpop.permute.xlu0 %159 }
 0x122   :  { %163 = vst.msk [vmem:[%s291_s4] sm:$0x3] %vm162_vm0, %v160_v61 }
 0x123   :  { %177 = vsyncpa [#allocation3], 1 }
 0x124   :  { %178 = vsyncpa [#allocation5], 1 }

// kernel: wavelet_dwt_layer_forward.4
= control target key start
LH: loop header
LB: loop body
LE: loop exit
PB: predicated region body
PF: predicated region fallthrough
CT: control target
= control target key end

     0   :  { %11 = vsyncpa [#allocation3], 0  ;;  %s287_s0 = inlined_call_operand.vmem [shape: f32[2,8], index: 0, kind: input, shape index: {}]   ;;  %s288_s1 = inlined_call_operand.vmem [shape: f32[2,8], index: 1, kind: input, shape index: {}]   ;;  %s289_s2 = inlined_call_operand.vmem [shape: f32[8], index: 2, kind: input, shape index: {}]   ;;  %s290_s3 = inlined_call_operand.vmem [shape: f32[8], index: 3, kind: input, shape index: {}]   ;;  %s291_s4 = inlined_call_operand.vmem [shape: f32[2,5], index: 4, kind: output, shape index: {0}]   ;;  %s292_s5 = inlined_call_operand.vmem [shape: f32[2,5], index: 5, kind: output, shape index: {1}]  }
   0x1   :  { %s23_s20 = sshll.u32 %s289_s2, 4  ;;  %s24_s20 = int_to_ptr.vmem [resolvable:$true] %s23_s20 }
   0x2   :  { %12 = vsyncpa [#allocation5], 0  ;;  %s33_s23 = sshll.u32 %s290_s3, 4  ;;  %s199_s24 = scalar_lea.vmem %s24_s20, 16  ;;  %s34_s23 = int_to_ptr.vmem [resolvable:$true] %s33_s23 }
   0x3   :  { %p200_p0 = scmp.ne.s32.totalorder %s24_s20, %s199_s24  ;;  %p204_p1 = scmp.lt.s32.totalorder %s24_s20, %s24_s20 }
   0x4   :  { %p205_p2 = scmp.lt.s32.totalorder %s199_s24, %s199_s24 }
   0x6   :  { %p206_p3 = por %p205_p2, %p204_p1 }
   0x8   :  { %p207_p4 = pnand %p206_p3, %p200_p0 }
   0xa   :  { %210 = shalt.err (!%p207_p4)
}
   0xb   :  { %s227_s25 = smov [#allocation2]   ;;  %s211_s26 = scalar_lea.vmem %s34_s23, 16 }
   0xc   :  { %26 = dma.vmem_to_smem %s24_s20, 16, %s227_s25, [#allocation3]  }
   0xd   :  { %p212_p5 = scmp.ne.s32.totalorder %s34_s23, %s211_s26  ;;  %p216_p6 = scmp.lt.s32.totalorder %s34_s23, %s34_s23 }
   0xe   :  { %p217_p7 = scmp.lt.s32.totalorder %s211_s26, %s211_s26 }
  0x10   :  { %p218_p8 = por %p217_p7, %p216_p6 }
  0x12   :  { %p219_p9 = pnand %p218_p8, %p212_p5 }
  0x14   :  { %222 = shalt.err (!%p219_p9)
}
  0x15   :  { %s228_s2 = smov [#allocation4]  }
  0x16   :  { %36 = dma.vmem_to_smem %s34_s23, 16, %s228_s2, [#allocation5]  }
  0x17   :  { %223 = dma.done.wait [#allocation3], 16  }
  0x18   :  { %224 = vsyncadd [#allocation3], 4294967280 }
  0x19   :  { %225 = dma.done.wait [#allocation5], 16  }
  0x1a   :  { %226 = vsyncadd [#allocation5], 4294967280 }
  0x1b   :  { %43 = sfence }
  0x1c   :  { %s187_s3 = sld [smem:[#allocation4 + $0x2]]  ;;  %s188_s28 = sld [smem:[#allocation4 + $0x3]]  ;;  %v45_v0 = vld [vmem:[%s288_s1] sm:$0x3]  ;;  %vm162_vm0 = vcmask 33792  }
  0x1d   :  { %s180_s27 = sld [smem:[#allocation2 + $0x2]]  ;;  %s181_s29 = sld [smem:[#allocation2 + $0x3]]  ;;  %v44_v1 = vld [vmem:[%s287_s0] sm:$0x3] }
  0x1e   :  { %s183_s30 = sld [smem:[#allocation2 + $0x5]]  ;;  %s182_s6 = sld [smem:[#allocation2 + $0x4]] }
  0x1f   :  { %s275_s11 = sld [smem:[#allocation4 + $0x5]]  ;;  %s277_s12 = sld [smem:[#allocation4 + $0x4]] }
  0x20   :  { %s46_s13 = sld [smem:[#allocation2]]  ;;  %s179_s15 = sld [smem:[#allocation2 + $0x1]] }
  0x21   :  { %s54_s14 = sld [smem:[#allocation4]]  ;;  %s229_s16 = smov 1  }
  0x22   :  { %v81_v2 = vstv %s187_s3  ;;  %v95_v5 = vstv %s188_s28  ;;  %s186_s1 = sld [smem:[#allocation4 + $0x1]]  ;;  %s185_s0 = sld [smem:[#allocation2 + $0x7]] }
  0x23   :  { %v82_v3 = vmul.f32 %v81_v2, %v45_v0  ;;  %v74_v4 = vstv %s180_s27  ;;  %v88_v7 = vstv %s181_s29  ;;  %v96_v8 = vmul.f32 %v95_v5, %v45_v0  ;;  %s184_s17 = sld [smem:[#allocation2 + $0x6]]  ;;  %s192_s18 = sld [smem:[#allocation4 + $0x7]] }
  0x24   :  { %v75_v6 = vmul.f32 %v74_v4, %v44_v1  ;;  %v89_v9 = vmul.f32 %v88_v7, %v44_v1  ;;  %v116_v10 = vstv %s183_s30  ;;  %v102_v11 = vstv %s182_s6  ;;  %s191_s19 = sld [smem:[#allocation4 + $0x6]]  ;;  %s230_s20 = smov 2  }
  0x25   :  { %84 = vrot.lane.b32.xlu1 %v82_v3, %s229_s16  ;;  %v117_v12 = vmul.f32 %v116_v10, %v44_v1  ;;  %v103_v13 = vmul.f32 %v102_v11, %v44_v1  ;;  %v123_v15 = vstv %s275_s11  ;;  %v109_v19 = vstv %s277_s12  ;;  %s231_s21 = smov 3   ;;  %s232_s22 = smov 125  }
  0x26   :  { %77 = vrot.lane.b32.xlu0 %v75_v6, %s229_s16  ;;  %v62_v14 = vstv %s46_s13  ;;  %v68_v18 = vstv %s179_s15  ;;  %v124_v24 = vmul.f32 %v123_v15, %v45_v0  ;;  %v110_v26 = vmul.f32 %v109_v19, %v45_v0 }
  0x27   :  { %v65_v16 = vstv %s54_s14  ;;  %v63_v17 = vmul.f32 %v62_v14, %v44_v1  ;;  %v69_v22 = vmul.f32 %v68_v18, %v44_v1 }
  0x28   :  { %v66_v20 = vmul.f32 %v65_v16, %v45_v0  ;;  %v71_v21 = vstv %s186_s1  ;;  %v144_v27 = vstv %s185_s0 }
  0x29   :  { %98 = vrot.lane.b32.xlu1 %v96_v8, %s229_s16  ;;  %v72_v23 = vmul.f32 %v71_v21, %v45_v0  ;;  %v130_v29 = vstv %s184_s17  ;;  %v145_v30 = vmul.f32 %v144_v27, %v44_v1  ;;  %v151_v32 = vstv %s192_s18 }
  0x2a   :  { %91 = vrot.lane.b32.xlu0 %v89_v9, %s229_s16  ;;  %v67_v25 = vadd.f32 %v66_v20, %v63_v17  ;;  %v131_v31 = vmul.f32 %v130_v29, %v44_v1  ;;  %v137_v33 = vstv %s191_s19  ;;  %v152_v34 = vmul.f32 %v151_v32, %v45_v0 }
  0x2b   :  { %v73_v28 = vadd.f32 %v72_v23, %v69_v22  ;;  %v138_v35 = vmul.f32 %v137_v33, %v45_v0 }
  0x2d   :  { %119 = vrot.lane.b32.xlu1 %v117_v12, %s230_s20 }
  0x2e   :  { %105 = vrot.lane.b32.xlu0 %v103_v13, %s230_s20 }
  0x31   :  { %126 = vrot.lane.b32.xlu1 %v124_v24, %s230_s20 }
  0x32   :  { %112 = vrot.lane.b32.xlu0 %v110_v26, %s230_s20 }
  0x35   :  { %147 = vrot.lane.b32.xlu1 %v145_v30, %s231_s21 }
  0x36   :  { %133 = vrot.lane.b32.xlu0 %v131_v31, %s231_s21 }
  0x39   :  { %154 = vrot.lane.b32.xlu1 %v152_v34, %s231_s21 }
  0x3a   :  { %140 = vrot.lane.b32.xlu0 %v138_v35, %s231_s21 }
  0x97   :  { %v85_v36 = vpop.permute.xlu1 %84 }
  0x98   :  { %v78_v37 = vpop.permute.xlu0 %77 }
  0x99   :  { %v80_v43 = vadd.f32 %v78_v37, %v67_v25 }
  0x9b   :  { %v99_v38 = vpop.permute.xlu1 %98  ;;  %v87_v47 = vadd.f32 %v85_v36, %v80_v43 }
  0x9c   :  { %v92_v39 = vpop.permute.xlu0 %91 }
  0x9d   :  { %v94_v40 = vadd.f32 %v92_v39, %v73_v28 }
  0x9f   :  { %v120_v41 = vpop.permute.xlu1 %119  ;;  %v101_v44 = vadd.f32 %v99_v38, %v94_v40 }
  0xa0   :  { %v106_v42 = vpop.permute.xlu0 %105 }
  0xa1   :  { %v122_v48 = vadd.f32 %v120_v41, %v101_v44  ;;  %v108_v49 = vadd.f32 %v106_v42, %v87_v47 }
  0xa3   :  { %v127_v45 = vpop.permute.xlu1 %126 }
  0xa4   :  { %v113_v46 = vpop.permute.xlu0 %112  ;;  %v129_v51 = vadd.f32 %v127_v45, %v122_v48 }
  0xa5   :  { %v115_v53 = vadd.f32 %v113_v46, %v108_v49 }
  0xa7   :  { %v148_v50 = vpop.permute.xlu1 %147 }
  0xa8   :  { %v134_v52 = vpop.permute.xlu0 %133  ;;  %v150_v54 = vadd.f32 %v148_v50, %v129_v51 }
  0xa9   :  { %v136_v55 = vadd.f32 %v134_v52, %v115_v53 }
  0xab   :  { %v155_v56 = vpop.permute.xlu1 %154 }
  0xac   :  { %v157_v57 = vadd.f32 %v155_v56, %v150_v54  ;;  %v141_v58 = vpop.permute.xlu0 %140 }
  0xad   :  { %v143_v59 = vadd.f32 %v141_v58, %v136_v55 }
  0xae   :  { %165 = vrot.lane.b32.xlu1 %v157_v57, %s232_s22 }
  0xaf   :  { %159 = vrot.lane.b32.xlu0 %v143_v59, %s232_s22 }
 0x120   :  { %v166_v60 = vpop.permute.xlu1 %165 }
 0x121   :  { %168 = vst.msk [vmem:[%s292_s5] sm:$0x3] %vm162_vm0, %v166_v60  ;;  %v160_v61 = vpop.permute.xlu0 %159 }
 0x122   :  { %163 = vst.msk [vmem:[%s291_s4] sm:$0x3] %vm162_vm0, %v160_v61 }
 0x123   :  { %177 = vsyncpa [#allocation3], 1 }
 0x124   :  { %178 = vsyncpa [#allocation5], 1 }

// kernel: wavelet_dwt_layer_forward.3
= control target key start
LH: loop header
LB: loop body
LE: loop exit
PB: predicated region body
PF: predicated region fallthrough
CT: control target
= control target key end

     0   :  { %11 = vsyncpa [#allocation6], 0  ;;  %s415_s0 = inlined_call_operand.vmem [shape: f32[2,6], index: 0, kind: input, shape index: {}]   ;;  %s416_s1 = inlined_call_operand.vmem [shape: f32[2,6], index: 1, kind: input, shape index: {}]   ;;  %s417_s2 = inlined_call_operand.vmem [shape: f32[8], index: 2, kind: input, shape index: {}]   ;;  %s418_s3 = inlined_call_operand.vmem [shape: f32[8], index: 3, kind: input, shape index: {}]   ;;  %s419_s4 = inlined_call_operand.hbm [shape: f32[2,9], index: 4, kind: output, shape index: {0}]   ;;  %s420_s5 = inlined_call_operand.vmem [shape: f32[2,9], index: 5, kind: output, shape index: {1}]  }
   0x1   :  { %12 = vsyncpa [#allocation8], 0 }
   0x2   :  { %13 = vsyncpa [#allocation5], 0  ;;  %s24_s20 = sshll.u32 %s417_s2, 4  ;;  %s34_s23 = sshll.u32 %s418_s3, 4  ;;  %s25_s20 = int_to_ptr.vmem [resolvable:$true] %s24_s20  ;;  %s35_s23 = int_to_ptr.vmem [resolvable:$true] %s34_s23 }
   0x3   :  { %s268_s24 = scalar_lea.vmem %s25_s20, 16  ;;  %p273_p1 = scmp.lt.s32.totalorder %s25_s20, %s25_s20 }
   0x4   :  { %p269_p0 = scmp.ne.s32.totalorder %s25_s20, %s268_s24  ;;  %p274_p2 = scmp.lt.s32.totalorder %s268_s24, %s268_s24 }
   0x6   :  { %p275_p3 = por %p274_p2, %p273_p1 }
   0x8   :  { %p276_p4 = pnand %p275_p3, %p269_p0 }
   0xa   :  { %279 = shalt.err (!%p276_p4)
}
   0xb   :  { %s320_s25 = smov [#allocation4]   ;;  %s280_s26 = scalar_lea.vmem %s35_s23, 16 }
   0xc   :  { %27 = dma.vmem_to_smem %s25_s20, 16, %s320_s25, [#allocation6]  }
   0xd   :  { %p281_p5 = scmp.ne.s32.totalorder %s35_s23, %s280_s26  ;;  %p285_p6 = scmp.lt.s32.totalorder %s35_s23, %s35_s23 }
   0xe   :  { %p286_p7 = scmp.lt.s32.totalorder %s280_s26, %s280_s26 }
  0x10   :  { %p287_p8 = por %p286_p7, %p285_p6 }
  0x12   :  { %p288_p9 = pnand %p287_p8, %p281_p5 }
  0x14   :  { %291 = shalt.err (!%p288_p9)
}
  0x15   :  { %s321_s2 = smov [#allocation7]  }
  0x16   :  { %37 = dma.vmem_to_smem %s35_s23, 16, %s321_s2, [#allocation8]  }
  0x17   :  { %314 = dma.done.wait [#allocation6], 16  }
  0x18   :  { %315 = vsyncadd [#allocation6], 4294967280 }
  0x19   :  { %316 = dma.done.wait [#allocation8], 16  }
  0x1a   :  { %317 = vsyncadd [#allocation8], 4294967280 }
  0x1b   :  { %44 = sfence }
  0x1c   :  { %v45_v0 = vld [vmem:[%s415_s0] sm:$0x3]  ;;  %s322_s30 = smov 3   ;;  %s323_s6 = smov 126   ;;  %vm51_vm0 = vcmask 66584   ;;  %vm61_vm1 = vcmask 1024  }
  0x1d   :  { %v46_v1 = vld [vmem:[%s416_s1] sm:$0x3]  ;;  %48 = vrot.lane.b32.xlu0 %v45_v0, %s322_s30  ;;  %s324_s7 = smov 2   ;;  %s325_s8 = smov 4   ;;  %vm67_vm2 = vcmask 9224   ;;  %vm73_vm3 = vcmask 17424  }
  0x1e   :  { %54 = vrot.lane.b32.xlu1 %v46_v1, %s322_s30  ;;  %s326_s9 = smov 6   ;;  %s327_s0 = smov 8   ;;  %vm82_vm4 = vcmask 74824   ;;  %vm87_vm5 = vcmask 83024   ;;  %vm92_vm6 = vcmask 91224   ;;  %vm220_vm7 = vcmask 66560  }
  0x1f   :  { %s251_s1 = sld [smem:[#allocation7 + $0x2]]  ;;  %s379_s11 = sld [smem:[#allocation7]] }
  0x20   :  { %s244_s10 = sld [smem:[#allocation4 + $0x2]]  ;;  %s381_s12 = sld [smem:[#allocation4]] }
  0x21   :  { %58 = vrot.lane.b32.xlu0 %v46_v1, %s323_s6  ;;  %s252_s13 = sld [smem:[#allocation7 + $0x3]]  ;;  %s250_s15 = sld [smem:[#allocation7 + $0x1]] }
  0x22   :  { %63 = vrot.lane.b32.xlu1 %v45_v0, %s323_s6  ;;  %s245_s14 = sld [smem:[#allocation4 + $0x3]]  ;;  %s383_s16 = sld [smem:[#allocation4 + $0x1]] }
  0x23   :  { %s387_s17 = sld [smem:[#allocation7 + $0x4]]  ;;  %s328_s19 = smov 127  }
  0x24   :  { %s389_s18 = sld [smem:[#allocation4 + $0x4]]  ;;  %s254_s20 = sld [smem:[#allocation7 + $0x5]] }
  0x25   :  { %70 = vrot.lane.b32.xlu0 %v46_v1, %s324_s7  ;;  %v150_v14 = vstv %s251_s1  ;;  %s247_s21 = sld [smem:[#allocation4 + $0x5]]  ;;  %v130_v21 = vstv %s379_s11  ;;  %s255_s22 = sld [smem:[#allocation7 + $0x6]] }
  0x26   :  { %79 = vrot.lane.b32.xlu1 %v46_v1, %s325_s8  ;;  %v136_v15 = vstv %s244_s10  ;;  %v124_v23 = vstv %s381_s12  ;;  %s248_s23 = sld [smem:[#allocation4 + $0x6]]  ;;  %s256_s24 = sld [smem:[#allocation7 + $0x7]] }
  0x27   :  { %v157_v19 = vstv %s252_s13  ;;  %v133_v22 = vstv %s250_s15  ;;  %s249_s25 = sld [smem:[#allocation4 + $0x7]]  ;;  %s329_s26 = smov 125  }
  0x28   :  { %v143_v20 = vstv %s245_s14  ;;  %v127_v24 = vstv %s383_s16  ;;  %s330_s2 = smov [#allocation9]  }
  0x29   :  { %75 = vrot.lane.b32.xlu0 %v45_v0, %s324_s7  ;;  %v178_v28 = vstv %s387_s17  ;;  %s229_s3 = sshll.u32 %s330_s2, 4  ;;  %s230_s3 = int_to_ptr.vmem [resolvable:$true] %s229_s3 }
  0x2a   :  { %84 = vrot.lane.b32.xlu1 %v46_v1, %s326_s9  ;;  %v164_v29 = vstv %s389_s18  ;;  %v185_v38 = vstv %s254_s20  ;;  %s292_s29 = scalar_lea.vmem %s230_s3, 32  ;;  %p297_p11 = scmp.lt.s32.totalorder %s230_s3, %s230_s3 }
  0x2b   :  { %v171_v39 = vstv %s247_s21  ;;  %v206_v42 = vstv %s255_s22  ;;  %p293_p10 = scmp.ne.s32.totalorder %s230_s3, %s292_s29  ;;  %p298_p12 = scmp.lt.s32.totalorder %s292_s29, %s292_s29 }
  0x2c   :  { %v192_v43 = vstv %s248_s23  ;;  %v213_v46 = vstv %s256_s24 }
  0x2d   :  { %89 = vrot.lane.b32.xlu0 %v46_v1, %s327_s0  ;;  %v199_v47 = vstv %s249_s25  ;;  %p299_p13 = por %p298_p12, %p297_p11 }
  0x2e   :  { %94 = vrot.lane.b32.xlu1 %v45_v0, %s325_s8 }
  0x2f   :  { %p300_p0 = pnand %p299_p13, %p293_p10 }
  0x31   :  { %98 = vrot.lane.b32.xlu0 %v45_v0, %s326_s9 }
  0x32   :  { %102 = vrot.lane.b32.xlu1 %v45_v0, %s327_s0 }
  0x8f   :  { %v49_v2 = vpop.permute.xlu0 %48 }
  0x90   :  { %v55_v3 = vpop.permute.xlu1 %54  ;;  %52 = vst.msk [vmem:[#allocation2] sm:$0x3] %vm51_vm0, %v49_v2 }
  0x91   :  { %57 = vst.msk [vmem:[#allocation3] sm:$0x3] %vm51_vm0, %v55_v3 }
  0x93   :  { %v59_v4 = vpop.permute.xlu0 %58 }
  0x94   :  { %v64_v5 = vpop.permute.xlu1 %63  ;;  %62 = vst.msk [vmem:[#allocation2] sm:$0x3] %vm61_vm1, %v59_v4 }
  0x95   :  { %66 = vst.msk [vmem:[#allocation3] sm:$0x3] %vm61_vm1, %v64_v5 }
  0x96   :  { %68 = vst.msk [vmem:[#allocation2] sm:$0x3] %vm67_vm2, %v46_v1  ;;  %69 = vst.msk [vmem:[#allocation3] sm:$0x3] %vm67_vm2, %v45_v0 }
  0x97   :  { %v71_v6 = vpop.permute.xlu0 %70 }
  0x98   :  { %v80_v7 = vpop.permute.xlu1 %79  ;;  %74 = vst.msk [vmem:[#allocation2] sm:$0x3] %vm73_vm3, %v71_v6 }
  0x99   :  { %83 = vst.msk [vmem:[#allocation2] sm:$0x3] %vm82_vm4, %v80_v7 }
  0x9b   :  { %v76_v8 = vpop.permute.xlu0 %75 }
  0x9c   :  { %v85_v9 = vpop.permute.xlu1 %84  ;;  %78 = vst.msk [vmem:[#allocation3] sm:$0x3] %vm73_vm3, %v76_v8 }
  0x9d   :  { %88 = vst.msk [vmem:[#allocation2] sm:$0x3] %vm87_vm5, %v85_v9 }
  0x9f   :  { %v90_v10 = vpop.permute.xlu0 %89 }
  0xa0   :  { %v95_v11 = vpop.permute.xlu1 %94  ;;  %93 = vst.msk [vmem:[#allocation2] sm:$0x3] %vm92_vm6, %v90_v10 }
  0xa1   :  { %97 = vst.msk [vmem:[#allocation3] sm:$0x3] %vm82_vm4, %v95_v11 }
  0xa3   :  { %v99_v12 = vpop.permute.xlu0 %98 }
  0xa4   :  { %v103_v13 = vpop.permute.xlu1 %102  ;;  %101 = vst.msk [vmem:[#allocation3] sm:$0x3] %vm87_vm5, %v99_v12 }
  0xa5   :  { %105 = vst.msk [vmem:[#allocation3] sm:$0x3] %vm92_vm6, %v103_v13 }
  0xa7   :  { %v106_v16 = vld [vmem:[#allocation2] sm:$0x3] }
  0xa8   :  { %v151_v17 = vmul.f32 %v150_v14, %v106_v16  ;;  %v137_v18 = vmul.f32 %v136_v15, %v106_v16  ;;  %v131_v30 = vmul.f32 %v130_v21, %v106_v16  ;;  %v125_v32 = vmul.f32 %v124_v23, %v106_v16 }
  0xa9   :  { %v179_v36 = vmul.f32 %v178_v28, %v106_v16  ;;  %v165_v37 = vmul.f32 %v164_v29, %v106_v16  ;;  %v207_v44 = vmul.f32 %v206_v42, %v106_v16  ;;  %v193_v45 = vmul.f32 %v192_v43, %v106_v16 }
  0xaa   :  { %153 = vrot.lane.b32.xlu1 %v151_v17, %s328_s19  ;;  %139 = vrot.lane.b32.xlu0 %v137_v18, %s328_s19 }
  0xac   :  { %v107_v25 = vld [vmem:[#allocation3] sm:$0x3] }
  0xad   :  { %v158_v26 = vmul.f32 %v157_v19, %v107_v25  ;;  %v144_v27 = vmul.f32 %v143_v20, %v107_v25  ;;  %v134_v31 = vmul.f32 %v133_v22, %v107_v25  ;;  %v128_v33 = vmul.f32 %v127_v24, %v107_v25 }
  0xae   :  { %v186_v40 = vmul.f32 %v185_v38, %v107_v25  ;;  %v172_v41 = vmul.f32 %v171_v39, %v107_v25  ;;  %v214_v48 = vmul.f32 %v213_v46, %v107_v25  ;;  %v200_v49 = vmul.f32 %v199_v47, %v107_v25 }
  0xaf   :  { %160 = vrot.lane.b32.xlu1 %v158_v26, %s328_s19  ;;  %146 = vrot.lane.b32.xlu0 %v144_v27, %s328_s19  ;;  %v135_v34 = vadd.f32 %v134_v31, %v131_v30  ;;  %v129_v35 = vadd.f32 %v128_v33, %v125_v32 }
  0xb3   :  { %181 = vrot.lane.b32.xlu1 %v179_v36, %s323_s6  ;;  %167 = vrot.lane.b32.xlu0 %v165_v37, %s323_s6 }
  0xb7   :  { %188 = vrot.lane.b32.xlu1 %v186_v40, %s323_s6  ;;  %174 = vrot.lane.b32.xlu0 %v172_v41, %s323_s6 }
  0xbb   :  { %209 = vrot.lane.b32.xlu1 %v207_v44, %s329_s26  ;;  %195 = vrot.lane.b32.xlu0 %v193_v45, %s329_s26 }
  0xbf   :  { %216 = vrot.lane.b32.xlu1 %v214_v48, %s329_s26  ;;  %202 = vrot.lane.b32.xlu0 %v200_v49, %s329_s26 }
 0x11c   :  { %v154_v50 = vpop.permute.xlu1 %153  ;;  %v140_v51 = vpop.permute.xlu0 %139 }
 0x11d   :  { %v156_v56 = vadd.f32 %v154_v50, %v135_v34  ;;  %v142_v57 = vadd.f32 %v140_v51, %v129_v35 }
 0x121   :  { %v161_v52 = vpop.permute.xlu1 %160  ;;  %v147_v53 = vpop.permute.xlu0 %146 }
 0x122   :  { %v163_v60 = vadd.f32 %v161_v52, %v156_v56  ;;  %v149_v61 = vadd.f32 %v147_v53, %v142_v57 }
 0x125   :  { %v182_v54 = vpop.permute.xlu1 %181  ;;  %v168_v55 = vpop.permute.xlu0 %167 }
 0x126   :  { %v184_v62 = vadd.f32 %v182_v54, %v163_v60  ;;  %v170_v63 = vadd.f32 %v168_v55, %v149_v61 }
 0x129   :  { %v189_v58 = vpop.permute.xlu1 %188  ;;  %v175_v59 = vpop.permute.xlu0 %174 }
 0x12a   :  { %v191_v2 = vadd.f32 %v189_v58, %v184_v62  ;;  %v177_v3 = vadd.f32 %v175_v59, %v170_v63 }
 0x12d   :  { %v210_v0 = vpop.permute.xlu1 %209  ;;  %v196_v1 = vpop.permute.xlu0 %195 }
 0x12e   :  { %v212_v4 = vadd.f32 %v210_v0, %v191_v2  ;;  %v198_v5 = vadd.f32 %v196_v1, %v177_v3 }
 0x131   :  { %v217_v6 = vpop.permute.xlu1 %216  ;;  %v203_v7 = vpop.permute.xlu0 %202 }
 0x132   :  { %v219_v8 = vadd.f32 %v217_v6, %v212_v4  ;;  %v205_v9 = vadd.f32 %v203_v7, %v198_v5 }
 0x134   :  { %221 = vst.msk [vmem:[#allocation9] sm:$0x3] %vm220_vm7, %v205_v9  ;;  %222 = vst.msk [vmem:[%s420_s5] sm:$0x3] %vm220_vm7, %v219_v8 }
 0x135   :  { %303 = shalt.err (!%p300_p0)
}
 0x136   :  { %s304_s7 = scalar_lea.hbm %s419_s4, 32 }
 0x137   :  { %p305_p1 = scmp.ne.s32.totalorder %s419_s4, %s304_s7  ;;  %p308_p2 = scmp.lt.u32.totalorder %s304_s7, %s419_s4 }
 0x139   :  { %p310_p3 = pnand %p308_p2, %p305_p1 }
 0x13b   :  { %313 = shalt.err (!%p310_p3)
}
 0x13c   :  { %232 = dma.vmem_to_hbm [thread:$0]  %s230_s3, 32, %s419_s4, [#allocation5]  }
 0x13d   :  { %318 = dma.done.wait [#allocation5], 32  }
 0x13e   :  { %319 = vsyncadd [#allocation5], 4294967264 }
 0x13f   :  { %240 = vsyncpa [#allocation5], 1 }
 0x140   :  { %241 = vsyncpa [#allocation6], 1 }
 0x141   :  { %242 = vsyncpa [#allocation8], 1 }

</bundles_post_ra>
